<compile_context>
chip_gen: v6e
topology: v6e:2x2x1
jax: 0.10.0
libtpu: 0.0.40
codegen_flags: <defaults>
</compile_context>

<pallas_src>
import functools

import jax
import jax.numpy as jnp
from jax import lax
from jax.experimental import pallas as pl
from jax.experimental.pallas import tpu as pltpu


_VMEM_LIMIT = 32 * 1024 * 1024  # explicit scoped-VMEM budget (safe on v5e/v6e/v7x)


# ----------------------------------------------------------------------------
# Pallas kernel 1: pointwise (1x1x1) conv == tiled matmul over flattened points
# ----------------------------------------------------------------------------
def _pointwise_conv_kernel(x_ref, w_ref, b_ref, o_ref):
    # x: [TP, Cin] (bf16), w: [Cin, Cout] (bf16), b: [1, Cout] (f32)
    acc = jnp.dot(x_ref[...], w_ref[...], preferred_element_type=jnp.float32)
    o_ref[...] = (acc + b_ref[...]).astype(o_ref.dtype)


def pointwise_conv(x_pts, w, b, *, out_dtype=jnp.float32, tile=2048):
    """x_pts: [P, Cin], w: [Cin, Cout], b: [Cout] -> [P, Cout] (tiled over P)."""
    P, Cin = x_pts.shape
    Cout = w.shape[1]
    tp = min(tile, P)
    if tp < P:
        tp = max(128, (tp // 128) * 128)  # lane/sublane & bf16-packing friendly
    grid = (pl.cdiv(P, tp),)
    return pl.pallas_call(
        _pointwise_conv_kernel,
        out_shape=jax.ShapeDtypeStruct((P, Cout), out_dtype),
        grid_spec=pltpu.PrefetchScalarGridSpec(
            num_scalar_prefetch=0,
            grid=grid,
            in_specs=[
                pl.BlockSpec((tp, Cin), lambda i: (i, 0)),
                pl.BlockSpec((Cin, Cout), lambda i: (0, 0)),   # resident weights
                pl.BlockSpec((1, Cout), lambda i: (0, 0)),     # resident bias
            ],
            out_specs=pl.BlockSpec((tp, Cout), lambda i: (i, 0)),
        ),
        compiler_params=pltpu.CompilerParams(
            dimension_semantics=("parallel",),
            vmem_limit_bytes=_VMEM_LIMIT,
        ),
    )(x_pts, w, b.reshape(1, Cout).astype(jnp.float32))


# ----------------------------------------------------------------------------
# Pallas kernel 2: fused cluster + dispatch + proj conv, per batch element.
#   - per head: cosine-sim of PET centers vs MRI points (MXU matmul)
#   - sigmoid(beta + alpha * sim), hard argmax mask over centers
#   - aggregate MRI values into centers, dispatch back to points (lane-dense)
#   - project dispatched features through the proj 1x1x1 conv, accumulating
#     the [out_dim, N] output over heads -> output is already channels-first.
# ----------------------------------------------------------------------------
def _cluster_proj_kernel(c_ref, m_ref, vc_ref, vm_ref, w_ref, b_ref, sp_ref,
                         o_ref, *, heads):
    eps = 1e-12                 # matches F.normalize eps
    beta = sp_ref[0]
    alpha = sp_ref[1]

    out_dim = o_ref.shape[1]
    n_pts = o_ref.shape[2]
    n_centers = c_ref.shape[2]

    acc = jnp.zeros((out_dim, n_pts), jnp.float32)
    for e in range(heads):      # static unroll; heads is small
        c_e = c_ref[0, e].astype(jnp.float32)    # [M, hd]
        m_e = m_ref[0, e].astype(jnp.float32)    # [N, hd]
        vc_e = vc_ref[0, e].astype(jnp.float32)  # [M, hd]
        vm_e = vm_ref[0, e].astype(jnp.float32)  # [N, hd]
        w_e = w_ref[e].astype(jnp.float32)       # [out_dim, hd]

        # L2 normalize along channel dim (F.normalize: x / max(||x||, eps))
        cn = c_e / jnp.maximum(
            jnp.sqrt(jnp.sum(c_e * c_e, axis=-1, keepdims=True)), eps)
        mn = m_e / jnp.maximum(
            jnp.sqrt(jnp.sum(m_e * m_e, axis=-1, keepdims=True)), eps)

        # pairwise cosine similarity: [M, N]
        cos = jnp.einsum("mc,nc->mn", cn, mn, preferred_element_type=jnp.float32)
        sim = jax.nn.sigmoid(beta + alpha * cos)

        # hard assignment: keep only the (first) max center per MRI point
        center_ids = lax.broadcasted_iota(jnp.int32, sim.shape, 0)
        smax = jnp.max(sim, axis=0, keepdims=True)             # [1, N]
        is_max = sim >= smax
        first = jnp.min(jnp.where(is_max, center_ids, n_centers),
                        axis=0, keepdims=True)
        sim = sim * (center_ids == first).astype(sim.dtype)    # [M, N]

        # aggregate MRI values into PET-center slots
        agg = jnp.dot(sim, vm_e, preferred_element_type=jnp.float32) + vc_e
        denom = jnp.sum(sim, axis=-1, keepdims=True) + 1.0
        agg = agg * pl.reciprocal(denom, approx=True)           # [M, hd]

        # dispatch back to points (lane-dense), then fold in the proj conv:
        # disp_t[c, n] = sum_m agg[m, c] * sim[m, n]
        disp_t = jnp.einsum("mc,mn->cn", agg, sim,
                            preferred_element_type=jnp.float32)  # [hd, N]
        acc = acc + jnp.dot(w_e, disp_t,
                            preferred_element_type=jnp.float32)  # [out_dim, N]

    o_ref[0] = (acc + b_ref[...]).astype(o_ref.dtype)


def cluster_dispatch_proj(centers, mri, v_centers, v_mri, w_proj, b_proj,
                          sim_params, *, out_dtype=jnp.float32):
    """centers/v_centers: [B, heads, M, hd]; mri/v_mri: [B, heads, N, hd];
    w_proj: [heads, out_dim, hd]; b_proj: [out_dim, 1]; sim_params: [2] (beta, alpha).

    Returns channels-first [B, out_dim, N].
    """
    B, heads, M, hd = centers.shape
    N = mri.shape[2]
    out_dim = w_proj.shape[1]

    kernel = functools.partial(_cluster_proj_kernel, heads=heads)
    grid_spec = pltpu.PrefetchScalarGridSpec(
        num_scalar_prefetch=0,
        grid=(B,),
        in_specs=[
            pl.BlockSpec((1, heads, M, hd), lambda b: (b, 0, 0, 0)),
            pl.BlockSpec((1, heads, N, hd), lambda b: (b, 0, 0, 0)),
            pl.BlockSpec((1, heads, M, hd), lambda b: (b, 0, 0, 0)),
            pl.BlockSpec((1, heads, N, hd), lambda b: (b, 0, 0, 0)),
            pl.BlockSpec((heads, out_dim, hd), lambda b: (0, 0, 0)),  # resident
            pl.BlockSpec((out_dim, 1), lambda b: (0, 0)),             # resident
            pl.BlockSpec(memory_space=pltpu.MemorySpace.SMEM),
        ],
        out_specs=pl.BlockSpec((1, out_dim, N), lambda b: (b, 0, 0)),
    )
    return pl.pallas_call(
        kernel,
        out_shape=jax.ShapeDtypeStruct((B, out_dim, N), out_dtype),
        grid_spec=grid_spec,
        compiler_params=pltpu.CompilerParams(
            dimension_semantics=("parallel",),
            vmem_limit_bytes=_VMEM_LIMIT,
        ),
    )(centers, mri, v_centers, v_mri, w_proj, b_proj, sim_params)


# ----------------------------------------------------------------------------
# Glue (plain JAX): layout plumbing + adaptive avg pool (evenly divisible case)
# ----------------------------------------------------------------------------
def _to_points(x_ncwhd):
    # [B, C, W, H, D] -> [B*W*H*D, C]
    B, C, W, H, D = x_ncwhd.shape
    return jnp.transpose(x_ncwhd, (0, 2, 3, 4, 1)).reshape(B * W * H * D, C)


def init_params(key, dim, out_dim, heads, head_dim):
    hc = heads * head_dim
    ks = jax.random.split(key, 10)

    def w(k, cin, cout):
        return jax.random.normal(k, (cin, cout), jnp.float32) * 0.05

    def b(k, cout):
        return jax.random.normal(k, (cout,), jnp.float32) * 0.01

    return {
        "f_PET_w": w(ks[0], dim, hc), "f_PET_b": b(ks[1], hc),
        "f_MRI_w": w(ks[2], dim, hc), "f_MRI_b": b(ks[3], hc),
        "v_PET_w": w(ks[4], dim, hc), "v_PET_b": b(ks[5], hc),
        "v_MRI_w": w(ks[6], dim, hc), "v_MRI_b": b(ks[7], hc),
        "proj_w": w(ks[8], hc, out_dim), "proj_b": b(ks[9], out_dim),
        # sim_beta, sim_alpha (torch init: zeros(1), ones(1))
        "sim_params": jnp.array([0.0, 1.0], jnp.float32),
    }


@functools.partial(jax.jit,
                   static_argnames=("heads", "head_dim", "proposal", "fold",
                                    "compute_dtype"))
def cross_cluster_forward(PET, MRI, params, *, heads, head_dim,
                          proposal=(2, 2, 2), fold=(1, 1, 1),
                          compute_dtype=jnp.bfloat16):
    if not (fold[0] == 1 and fold[1] == 1 and fold[2] == 1):
        # TODO(synk): fold>1 branch is ill-defined in the reference (einops bug).
        raise NotImplementedError("Only fold=(1,1,1) is supported.")

    B, dim, W, H, D = PET.shape
    hc = heads * head_dim
    N = W * H * D
    pw, ph, pd = proposal
    M = pw * ph * pd
    cd = compute_dtype

    pet_pts = _to_points(PET).astype(cd)   # [B*N, dim]
    mri_pts = _to_points(MRI).astype(cd)

    # Fused 1x1x1 convs: [f | v] weights concatenated along Cout -> one pass per modality.
    w_pet = jnp.concatenate([params["f_PET_w"], params["v_PET_w"]], axis=1).astype(cd)
    b_pet = jnp.concatenate([params["f_PET_b"], params["v_PET_b"]], axis=0)
    w_mri = jnp.concatenate([params["f_MRI_w"], params["v_MRI_w"]], axis=1).astype(cd)
    b_mri = jnp.concatenate([params["f_MRI_b"], params["v_MRI_b"]], axis=0)

    pet_fv = pointwise_conv(pet_pts, w_pet, b_pet, out_dtype=cd)   # [B*N, 2*hc]
    mri_fv = pointwise_conv(mri_pts, w_mri, b_mri, out_dtype=cd)

    # MRI features/values: head-major [2, B, heads, N, hd] (f, v) so the fused
    # kernel indexes heads along a leading dim (no in-kernel lane slicing).
    mri_g = jnp.transpose(mri_fv.reshape(B, N, 2, heads, head_dim), (2, 0, 3, 1, 4))
    f_mri_g, v_mri_g = mri_g[0], mri_g[1]

    # AdaptiveAvgPool3d (evenly divisible) on PET features / values -> centers.
    pet_blk = pet_fv.reshape(B, pw, W // pw, ph, H // ph, pd, D // pd, 2 * hc)
    pet_pool = pet_blk.astype(jnp.float32).mean(axis=(2, 4, 6)).astype(cd)  # [B,pw,ph,pd,2hc]
    pet_cent = jnp.transpose(pet_pool.reshape(B, M, 2, heads, head_dim), (2, 0, 3, 1, 4))
    centers_f, centers_v = pet_cent[0], pet_cent[1]              # [B, heads, M, hd]

    # Proj weights pre-arranged head-major so the kernel emits channels-first
    # output directly: w_proj[e, o, c] == proj_w[e*hd + c, o].
    out_dim = params["proj_w"].shape[1]
    w_proj = jnp.transpose(params["proj_w"].reshape(heads, head_dim, out_dim),
                           (0, 2, 1))                            # [heads, out_dim, hd]
    b_proj = params["proj_b"].reshape(out_dim, 1)

    # Fused cluster + dispatch + proj (Pallas kernel): [B, out_dim, N]
    out = cluster_dispatch_proj(centers_f, f_mri_g, centers_v, v_mri_g,
                                w_proj, b_proj, params["sim_params"],
                                out_dtype=jnp.float32)

    # Channels-first already; final layout is a free reshape (no transpose).
    return out.reshape(B, out_dim, W, H, D)


if __name__ == "__main__":
    B, dim, W, H, D = 2, 4, 4, 4, 4
    out_dim, heads, head_dim = 8, 4, 24

    key = jax.random.PRNGKey(0)
    kp, kpet, kmri = jax.random.split(key, 3)
    params = init_params(kp, dim, out_dim, heads, head_dim)
    PET = jax.random.normal(kpet, (B, dim, W, H, D), jnp.float32)
    MRI = jax.random.normal(kmri, (B, dim, W, H, D), jnp.float32)

    out = cross_cluster_forward(PET, MRI, params, heads=heads, head_dim=head_dim,
                                proposal=(2, 2, 2), fold=(1, 1, 1))
    out = jax.block_until_ready(out)
    assert out.shape == (B, out_dim, W, H, D)
    assert bool(jnp.all(jnp.isfinite(out)))
    print("KERNEL_OK")
</pallas_src>

<mosaic_0001>
module attributes {stable_mosaic.version = 11 : i64} {
  func.func @_pointwise_conv_kernel(%arg0: i32, %arg1: memref<128x4xbf16, #tpu.memory_space<vmem>>, %arg2: memref<4x192xbf16, #tpu.memory_space<vmem>>, %arg3: memref<1x192xf32, #tpu.memory_space<vmem>>, %arg4: memref<128x192xbf16, #tpu.memory_space<vmem>>) attributes {dimension_semantics = [#tpu.dimension_semantics<parallel>], iteration_bounds = array<i64: 1>, scalar_prefetch = 0 : i64, scratch_operands = 0 : i64, tpu.core_type = #tpu.core_type<tc>, window_params = [{transform_indices = @transform_0, window_bounds = array<i64: 128, 4>}, {pipeline_mode = #tpu.pipeline_mode<synchronous>, transform_indices = @transform_1, window_bounds = array<i64: 4, 192>}, {pipeline_mode = #tpu.pipeline_mode<synchronous>, transform_indices = @transform_2, window_bounds = array<i64: 1, 192>}, {transform_indices = @transform_3, window_bounds = array<i64: 128, 192>}]} {
    %c0 = arith.constant 0 : index
    %c0_0 = arith.constant 0 : index
    %0 = vector.load %arg1[%c0, %c0_0] : memref<128x4xbf16, #tpu.memory_space<vmem>>, vector<128x4xbf16>
    %c0_1 = arith.constant 0 : index
    %c0_2 = arith.constant 0 : index
    %1 = vector.load %arg2[%c0_1, %c0_2] : memref<4x192xbf16, #tpu.memory_space<vmem>>, vector<4x192xbf16>
    %cst = arith.constant dense<0.000000e+00> : vector<128x192xf32>
    %2 = tpu.matmul %0, %1, %cst {dimension_numbers = #tpu.dot_dimension_numbers<[1], [0], [0], [1], [0, 0, 1, 1], [], []>} : vector<128x4xbf16>, vector<4x192xbf16>, vector<128x192xf32> -> vector<128x192xf32>
    %c0_3 = arith.constant 0 : index
    %c0_4 = arith.constant 0 : index
    %3 = vector.load %arg3[%c0_3, %c0_4] : memref<1x192xf32, #tpu.memory_space<vmem>>, vector<1x192xf32>
    %4 = vector.broadcast %3 : vector<1x192xf32> to vector<128x192xf32>
    %5 = arith.addf %2, %4 : vector<128x192xf32>
    %6 = arith.truncf %5 : vector<128x192xf32> to vector<128x192xbf16>
    %c0_5 = arith.constant 0 : index
    %c0_6 = arith.constant 0 : index
    %7 = vector.load %arg4[%c0_5, %c0_6] : memref<128x192xbf16, #tpu.memory_space<vmem>>, vector<128x192xbf16>
    tpu.vector_store %arg4[%c0_5, %c0_6], %6 {strides = array<i32>} : memref<128x192xbf16, #tpu.memory_space<vmem>>, vector<128x192xbf16>,
    return
  }
  func.func @transform_0(%arg0: i32) -> (i32, i32) {
    %c0_i32 = arith.constant 0 : i32
    %c0_i32_0 = arith.constant 0 : i32
    return %arg0, %c0_i32 : i32, i32
  }
  func.func @transform_1(%arg0: i32) -> (i32, i32) {
    %c0_i32 = arith.constant 0 : i32
    %c0_i32_0 = arith.constant 0 : i32
    %c0_i32_1 = arith.constant 0 : i32
    return %c0_i32, %c0_i32_0 : i32, i32
  }
  func.func @transform_2(%arg0: i32) -> (i32, i32) {
    %c0_i32 = arith.constant 0 : i32
    %c0_i32_0 = arith.constant 0 : i32
    %c0_i32_1 = arith.constant 0 : i32
    return %c0_i32, %c0_i32_0 : i32, i32
  }
  func.func @transform_3(%arg0: i32) -> (i32, i32) {
    %c0_i32 = arith.constant 0 : i32
    %c0_i32_0 = arith.constant 0 : i32
    return %arg0, %c0_i32 : i32, i32
  }
}

module attributes {stable_mosaic.version = 11 : i64} {
  func.func @_cluster_proj_kernel(%arg0: i32, %arg1: memref<1x4x8x24xbf16, #tpu.memory_space<vmem>>, %arg2: memref<1x4x64x24xbf16, #tpu.memory_space<vmem>>, %arg3: memref<1x4x8x24xbf16, #tpu.memory_space<vmem>>, %arg4: memref<1x4x64x24xbf16, #tpu.memory_space<vmem>>, %arg5: memref<4x8x24xf32, #tpu.memory_space<vmem>>, %arg6: memref<8x1xf32, #tpu.memory_space<vmem>>, %arg7: memref<2xf32, #tpu.memory_space<smem>>, %arg8: memref<1x8x64xf32, #tpu.memory_space<vmem>>) attributes {dimension_semantics = [#tpu.dimension_semantics<parallel>], iteration_bounds = array<i64: 2>, scalar_prefetch = 0 : i64, scratch_operands = 0 : i64, tpu.core_type = #tpu.core_type<tc>, window_params = [{transform_indices = @transform_0, window_bounds = array<i64: 1, 4, 8, 24>}, {transform_indices = @transform_1, window_bounds = array<i64: 1, 4, 64, 24>}, {transform_indices = @transform_2, window_bounds = array<i64: 1, 4, 8, 24>}, {transform_indices = @transform_3, window_bounds = array<i64: 1, 4, 64, 24>}, {pipeline_mode = #tpu.pipeline_mode<synchronous>, transform_indices = @transform_4, window_bounds = array<i64: 4, 8, 24>}, {pipeline_mode = #tpu.pipeline_mode<synchronous>, transform_indices = @transform_5, window_bounds = array<i64: 8, 1>}, {transform_indices = @transform_6, window_bounds = array<i64: 2>}, {transform_indices = @transform_7, window_bounds = array<i64: 1, 8, 64>}]} {
    %c0 = arith.constant 0 : index
    %0 = memref.load %arg7[%c0] : memref<2xf32, #tpu.memory_space<smem>>
    %c1 = arith.constant 1 : index
    %1 = memref.load %arg7[%c1] : memref<2xf32, #tpu.memory_space<smem>>
    %cst = arith.constant 0.000000e+00 : f32
    %2 = vector.broadcast %cst : f32 to vector<8x64xf32>
    %c0_0 = arith.constant 0 : index
    %c0_1 = arith.constant 0 : index
    %c0_2 = arith.constant 0 : index
    %c0_3 = arith.constant 0 : index
    %3 = vector.load %arg1[%c0_0, %c0_1, %c0_2, %c0_3] : memref<1x4x8x24xbf16, #tpu.memory_space<vmem>>, vector<1x1x8x24xbf16>
    %4 = vector.shape_cast %3 : vector<1x1x8x24xbf16> to vector<8x24xbf16>
    %5 = arith.extf %4 : vector<8x24xbf16> to vector<8x24xf32>
    %c0_4 = arith.constant 0 : index
    %c0_5 = arith.constant 0 : index
    %c0_6 = arith.constant 0 : index
    %c0_7 = arith.constant 0 : index
    %6 = vector.load %arg2[%c0_4, %c0_5, %c0_6, %c0_7] : memref<1x4x64x24xbf16, #tpu.memory_space<vmem>>, vector<1x1x64x24xbf16>
    %7 = vector.shape_cast %6 : vector<1x1x64x24xbf16> to vector<64x24xbf16>
    %8 = arith.extf %7 : vector<64x24xbf16> to vector<64x24xf32>
    %c0_8 = arith.constant 0 : index
    %c0_9 = arith.constant 0 : index
    %c0_10 = arith.constant 0 : index
    %c0_11 = arith.constant 0 : index
    %9 = vector.load %arg3[%c0_8, %c0_9, %c0_10, %c0_11] : memref<1x4x8x24xbf16, #tpu.memory_space<vmem>>, vector<1x1x8x24xbf16>
    %10 = vector.shape_cast %9 : vector<1x1x8x24xbf16> to vector<8x24xbf16>
    %11 = arith.extf %10 : vector<8x24xbf16> to vector<8x24xf32>
    %c0_12 = arith.constant 0 : index
    %c0_13 = arith.constant 0 : index
    %c0_14 = arith.constant 0 : index
    %c0_15 = arith.constant 0 : index
    %12 = vector.load %arg4[%c0_12, %c0_13, %c0_14, %c0_15] : memref<1x4x64x24xbf16, #tpu.memory_space<vmem>>, vector<1x1x64x24xbf16>
    %13 = vector.shape_cast %12 : vector<1x1x64x24xbf16> to vector<64x24xbf16>
    %14 = arith.extf %13 : vector<64x24xbf16> to vector<64x24xf32>
    %c0_16 = arith.constant 0 : index
    %c0_17 = arith.constant 0 : index
    %c0_18 = arith.constant 0 : index
    %15 = vector.load %arg5[%c0_16, %c0_17, %c0_18] : memref<4x8x24xf32, #tpu.memory_space<vmem>>, vector<1x8x24xf32>
    %16 = vector.shape_cast %15 : vector<1x8x24xf32> to vector<8x24xf32>
    %17 = arith.mulf %5, %5 : vector<8x24xf32>
    %cst_19 = arith.constant dense<0.000000e+00> : vector<8xf32>
    %18 = vector.multi_reduction <add>, %17, %cst_19 [1] : vector<8x24xf32> to vector<8xf32>
    %19 = vector.shape_cast %18 : vector<8xf32> to vector<8x1xf32>
    %20 = math.sqrt %19 : vector<8x1xf32>
    %cst_20 = arith.constant 9.99999996E-13 : f32
    %21 = vector.broadcast %cst_20 : f32 to vector<8x1xf32>
    %22 = arith.maximumf %20, %21 : vector<8x1xf32>
    %23 = vector.broadcast %22 : vector<8x1xf32> to vector<8x24xf32>
    %24 = arith.divf %5, %23 : vector<8x24xf32>
    %25 = arith.mulf %8, %8 : vector<64x24xf32>
    %cst_21 = arith.constant dense<0.000000e+00> : vector<64xf32>
    %26 = vector.multi_reduction <add>, %25, %cst_21 [1] : vector<64x24xf32> to vector<64xf32>
    %27 = vector.shape_cast %26 : vector<64xf32> to vector<64x1xf32>
    %28 = math.sqrt %27 : vector<64x1xf32>
    %cst_22 = arith.constant 9.99999996E-13 : f32
    %29 = vector.broadcast %cst_22 : f32 to vector<64x1xf32>
    %30 = arith.maximumf %28, %29 : vector<64x1xf32>
    %31 = vector.broadcast %30 : vector<64x1xf32> to vector<64x24xf32>
    %32 = arith.divf %8, %31 : vector<64x24xf32>
    "tpu.trace_start"() <{level = 10 : i32, message = "mc,nc->mn"}> : () -> ()
    %cst_23 = arith.constant dense<0.000000e+00> : vector<8x64xf32>
    %33 = tpu.matmul %24, %32, %cst_23 {dimension_numbers = #tpu.dot_dimension_numbers<[1], [1], [0], [0], [0, 0, 1, 0], [], []>} : vector<8x24xf32>, vector<64x24xf32>, vector<8x64xf32> -> vector<8x64xf32>
    "tpu.trace_stop"() : () -> ()
    %34 = vector.broadcast %1 : f32 to vector<8x64xf32>
    %35 = arith.mulf %34, %33 : vector<8x64xf32>
    %36 = vector.broadcast %0 : f32 to vector<8x64xf32>
    %37 = arith.addf %36, %35 : vector<8x64xf32>
    %38 = arith.negf %37 : vector<8x64xf32>
    %39 = math.exp %38 : vector<8x64xf32>
    %cst_24 = arith.constant 1.000000e+00 : f32
    %40 = vector.broadcast %cst_24 : f32 to vector<8x64xf32>
    %41 = arith.addf %40, %39 : vector<8x64xf32>
    %42 = arith.divf %40, %41 : vector<8x64xf32>
    %43 = tpu.iota {dimensions = array<i32: 0>} : vector<8x64xi32>
    %cst_25 = arith.constant dense<0xFF800000> : vector<64xf32>
    %44 = vector.multi_reduction <maximumf>, %42, %cst_25 [0] : vector<8x64xf32> to vector<64xf32>
    %45 = vector.shape_cast %44 : vector<64xf32> to vector<1x64xf32>
    %46 = vector.broadcast %45 : vector<1x64xf32> to vector<8x64xf32>
    %47 = arith.cmpf oge, %42, %46 : vector<8x64xf32>
    %c8_i32 = arith.constant 8 : i32
    %48 = vector.broadcast %c8_i32 : i32 to vector<8x64xi32>
    %49 = arith.select %47, %43, %48 : vector<8x64xi1>, vector<8x64xi32>
    %cst_26 = arith.constant dense<2147483647> : vector<64xi32>
    %50 = vector.multi_reduction <minsi>, %49, %cst_26 [0] : vector<8x64xi32> to vector<64xi32>
    %51 = vector.shape_cast %50 : vector<64xi32> to vector<1x64xi32>
    %52 = vector.broadcast %51 : vector<1x64xi32> to vector<8x64xi32>
    %53 = arith.cmpi eq, %43, %52 : vector<8x64xi32>
    %54 = arith.extui %53 : vector<8x64xi1> to vector<8x64xi32>
    %55 = arith.sitofp %54 : vector<8x64xi32> to vector<8x64xf32>
    %56 = arith.mulf %42, %55 : vector<8x64xf32>
    %cst_27 = arith.constant dense<0.000000e+00> : vector<8x24xf32>
    %57 = tpu.matmul %56, %14, %cst_27 {dimension_numbers = #tpu.dot_dimension_numbers<[1], [0], [0], [1], [0, 0, 1, 1], [], []>} : vector<8x64xf32>, vector<64x24xf32>, vector<8x24xf32> -> vector<8x24xf32>
    %58 = arith.addf %57, %11 : vector<8x24xf32>
    %cst_28 = arith.constant dense<0.000000e+00> : vector<8xf32>
    %59 = vector.multi_reduction <add>, %56, %cst_28 [1] : vector<8x64xf32> to vector<8xf32>
    %60 = vector.shape_cast %59 : vector<8xf32> to vector<8x1xf32>
    %cst_29 = arith.constant 1.000000e+00 : f32
    %61 = vector.broadcast %cst_29 : f32 to vector<8x1xf32>
    %62 = arith.addf %60, %61 : vector<8x1xf32>
    %63 = tpu.reciprocal %62 {approx = true} : vector<8x1xf32> -> vector<8x1xf32>
    %64 = vector.broadcast %63 : vector<8x1xf32> to vector<8x24xf32>
    %65 = arith.mulf %58, %64 : vector<8x24xf32>
    "tpu.trace_start"() <{level = 10 : i32, message = "mc,mn->cn"}> : () -> ()
    %cst_30 = arith.constant dense<0.000000e+00> : vector<24x64xf32>
    %66 = tpu.matmul %65, %56, %cst_30 {dimension_numbers = #tpu.dot_dimension_numbers<[0], [0], [1], [1], [0, 1, 1, 1], [], []>} : vector<8x24xf32>, vector<8x64xf32>, vector<24x64xf32> -> vector<24x64xf32>
    "tpu.trace_stop"() : () -> ()
    %cst_31 = arith.constant dense<0.000000e+00> : vector<8x64xf32>
    %67 = tpu.matmul %16, %66, %cst_31 {dimension_numbers = #tpu.dot_dimension_numbers<[1], [0], [0], [1], [0, 0, 1, 1], [], []>} : vector<8x24xf32>, vector<24x64xf32>, vector<8x64xf32> -> vector<8x64xf32>
    %68 = arith.addf %2, %67 : vector<8x64xf32>
    %c0_32 = arith.constant 0 : index
    %c1_33 = arith.constant 1 : index
    %c0_34 = arith.constant 0 : index
    %c0_35 = arith.constant 0 : index
    %69 = vector.load %arg1[%c0_32, %c1_33, %c0_34, %c0_35] : memref<1x4x8x24xbf16, #tpu.memory_space<vmem>>, vector<1x1x8x24xbf16>
    %70 = vector.shape_cast %69 : vector<1x1x8x24xbf16> to vector<8x24xbf16>
    %71 = arith.extf %70 : vector<8x24xbf16> to vector<8x24xf32>
    %c0_36 = arith.constant 0 : index
    %c1_37 = arith.constant 1 : index
    %c0_38 = arith.constant 0 : index
    %c0_39 = arith.constant 0 : index
    %72 = vector.load %arg2[%c0_36, %c1_37, %c0_38, %c0_39] : memref<1x4x64x24xbf16, #tpu.memory_space<vmem>>, vector<1x1x64x24xbf16>
    %73 = vector.shape_cast %72 : vector<1x1x64x24xbf16> to vector<64x24xbf16>
    %74 = arith.extf %73 : vector<64x24xbf16> to vector<64x24xf32>
    %c0_40 = arith.constant 0 : index
    %c1_41 = arith.constant 1 : index
    %c0_42 = arith.constant 0 : index
    %c0_43 = arith.constant 0 : index
    %75 = vector.load %arg3[%c0_40, %c1_41, %c0_42, %c0_43] : memref<1x4x8x24xbf16, #tpu.memory_space<vmem>>, vector<1x1x8x24xbf16>
    %76 = vector.shape_cast %75 : vector<1x1x8x24xbf16> to vector<8x24xbf16>
    %77 = arith.extf %76 : vector<8x24xbf16> to vector<8x24xf32>
    %c0_44 = arith.constant 0 : index
    %c1_45 = arith.constant 1 : index
    %c0_46 = arith.constant 0 : index
    %c0_47 = arith.constant 0 : index
    %78 = vector.load %arg4[%c0_44, %c1_45, %c0_46, %c0_47] : memref<1x4x64x24xbf16, #tpu.memory_space<vmem>>, vector<1x1x64x24xbf16>
    %79 = vector.shape_cast %78 : vector<1x1x64x24xbf16> to vector<64x24xbf16>
    %80 = arith.extf %79 : vector<64x24xbf16> to vector<64x24xf32>
    %c1_48 = arith.constant 1 : index
    %c0_49 = arith.constant 0 : index
    %c0_50 = arith.constant 0 : index
    %81 = vector.load %arg5[%c1_48, %c0_49, %c0_50] : memref<4x8x24xf32, #tpu.memory_space<vmem>>, vector<1x8x24xf32>
    %82 = vector.shape_cast %81 : vector<1x8x24xf32> to vector<8x24xf32>
    %83 = arith.mulf %71, %71 : vector<8x24xf32>
    %cst_51 = arith.constant dense<0.000000e+00> : vector<8xf32>
    %84 = vector.multi_reduction <add>, %83, %cst_51 [1] : vector<8x24xf32> to vector<8xf32>
    %85 = vector.shape_cast %84 : vector<8xf32> to vector<8x1xf32>
    %86 = math.sqrt %85 : vector<8x1xf32>
    %cst_52 = arith.constant 9.99999996E-13 : f32
    %87 = vector.broadcast %cst_52 : f32 to vector<8x1xf32>
    %88 = arith.maximumf %86, %87 : vector<8x1xf32>
    %89 = vector.broadcast %88 : vector<8x1xf32> to vector<8x24xf32>
    %90 = arith.divf %71, %89 : vector<8x24xf32>
    %91 = arith.mulf %74, %74 : vector<64x24xf32>
    %cst_53 = arith.constant dense<0.000000e+00> : vector<64xf32>
    %92 = vector.multi_reduction <add>, %91, %cst_53 [1] : vector<64x24xf32> to vector<64xf32>
    %93 = vector.shape_cast %92 : vector<64xf32> to vector<64x1xf32>
    %94 = math.sqrt %93 : vector<64x1xf32>
    %cst_54 = arith.constant 9.99999996E-13 : f32
    %95 = vector.broadcast %cst_54 : f32 to vector<64x1xf32>
    %96 = arith.maximumf %94, %95 : vector<64x1xf32>
    %97 = vector.broadcast %96 : vector<64x1xf32> to vector<64x24xf32>
    %98 = arith.divf %74, %97 : vector<64x24xf32>
    "tpu.trace_start"() <{level = 10 : i32, message = "mc,nc->mn"}> : () -> ()
    %cst_55 = arith.constant dense<0.000000e+00> : vector<8x64xf32>
    %99 = tpu.matmul %90, %98, %cst_55 {dimension_numbers = #tpu.dot_dimension_numbers<[1], [1], [0], [0], [0, 0, 1, 0], [], []>} : vector<8x24xf32>, vector<64x24xf32>, vector<8x64xf32> -> vector<8x64xf32>
    "tpu.trace_stop"() : () -> ()
    %100 = vector.broadcast %1 : f32 to vector<8x64xf32>
    %101 = arith.mulf %100, %99 : vector<8x64xf32>
    %102 = vector.broadcast %0 : f32 to vector<8x64xf32>
    %103 = arith.addf %102, %101 : vector<8x64xf32>
    %104 = arith.negf %103 : vector<8x64xf32>
    %105 = math.exp %104 : vector<8x64xf32>
    %cst_56 = arith.constant 1.000000e+00 : f32
    %106 = vector.broadcast %cst_56 : f32 to vector<8x64xf32>
    %107 = arith.addf %106, %105 : vector<8x64xf32>
    %108 = arith.divf %106, %107 : vector<8x64xf32>
    %109 = tpu.iota {dimensions = array<i32: 0>} : vector<8x64xi32>
    %cst_57 = arith.constant dense<0xFF800000> : vector<64xf32>
    %110 = vector.multi_reduction <maximumf>, %108, %cst_57 [0] : vector<8x64xf32> to vector<64xf32>
    %111 = vector.shape_cast %110 : vector<64xf32> to vector<1x64xf32>
    %112 = vector.broadcast %111 : vector<1x64xf32> to vector<8x64xf32>
    %113 = arith.cmpf oge, %108, %112 : vector<8x64xf32>
    %c8_i32_58 = arith.constant 8 : i32
    %114 = vector.broadcast %c8_i32_58 : i32 to vector<8x64xi32>
    %115 = arith.select %113, %109, %114 : vector<8x64xi1>, vector<8x64xi32>
    %cst_59 = arith.constant dense<2147483647> : vector<64xi32>
    %116 = vector.multi_reduction <minsi>, %115, %cst_59 [0] : vector<8x64xi32> to vector<64xi32>
    %117 = vector.shape_cast %116 : vector<64xi32> to vector<1x64xi32>
    %118 = vector.broadcast %117 : vector<1x64xi32> to vector<8x64xi32>
    %119 = arith.cmpi eq, %109, %118 : vector<8x64xi32>
    %120 = arith.extui %119 : vector<8x64xi1> to vector<8x64xi32>
    %121 = arith.sitofp %120 : vector<8x64xi32> to vector<8x64xf32>
    %122 = arith.mulf %108, %121 : vector<8x64xf32>
    %cst_60 = arith.constant dense<0.000000e+00> : vector<8x24xf32>
    %123 = tpu.matmul %122, %80, %cst_60 {dimension_numbers = #tpu.dot_dimension_numbers<[1], [0], [0], [1], [0, 0, 1, 1], [], []>} : vector<8x64xf32>, vector<64x24xf32>, vector<8x24xf32> -> vector<8x24xf32>
    %124 = arith.addf %123, %77 : vector<8x24xf32>
    %cst_61 = arith.constant dense<0.000000e+00> : vector<8xf32>
    %125 = vector.multi_reduction <add>, %122, %cst_61 [1] : vector<8x64xf32> to vector<8xf32>
    %126 = vector.shape_cast %125 : vector<8xf32> to vector<8x1xf32>
    %cst_62 = arith.constant 1.000000e+00 : f32
    %127 = vector.broadcast %cst_62 : f32 to vector<8x1xf32>
    %128 = arith.addf %126, %127 : vector<8x1xf32>
    %129 = tpu.reciprocal %128 {approx = true} : vector<8x1xf32> -> vector<8x1xf32>
    %130 = vector.broadcast %129 : vector<8x1xf32> to vector<8x24xf32>
    %131 = arith.mulf %124, %130 : vector<8x24xf32>
    "tpu.trace_start"() <{level = 10 : i32, message = "mc,mn->cn"}> : () -> ()
    %cst_63 = arith.constant dense<0.000000e+00> : vector<24x64xf32>
    %132 = tpu.matmul %131, %122, %cst_63 {dimension_numbers = #tpu.dot_dimension_numbers<[0], [0], [1], [1], [0, 1, 1, 1], [], []>} : vector<8x24xf32>, vector<8x64xf32>, vector<24x64xf32> -> vector<24x64xf32>
    "tpu.trace_stop"() : () -> ()
    %cst_64 = arith.constant dense<0.000000e+00> : vector<8x64xf32>
    %133 = tpu.matmul %82, %132, %cst_64 {dimension_numbers = #tpu.dot_dimension_numbers<[1], [0], [0], [1], [0, 0, 1, 1], [], []>} : vector<8x24xf32>, vector<24x64xf32>, vector<8x64xf32> -> vector<8x64xf32>
    %134 = arith.addf %68, %133 : vector<8x64xf32>
    %c0_65 = arith.constant 0 : index
    %c2 = arith.constant 2 : index
    %c0_66 = arith.constant 0 : index
    %c0_67 = arith.constant 0 : index
    %135 = vector.load %arg1[%c0_65, %c2, %c0_66, %c0_67] : memref<1x4x8x24xbf16, #tpu.memory_space<vmem>>, vector<1x1x8x24xbf16>
    %136 = vector.shape_cast %135 : vector<1x1x8x24xbf16> to vector<8x24xbf16>
    %137 = arith.extf %136 : vector<8x24xbf16> to vector<8x24xf32>
    %c0_68 = arith.constant 0 : index
    %c2_69 = arith.constant 2 : index
    %c0_70 = arith.constant 0 : index
    %c0_71 = arith.constant 0 : index
    %138 = vector.load %arg2[%c0_68, %c2_69, %c0_70, %c0_71] : memref<1x4x64x24xbf16, #tpu.memory_space<vmem>>, vector<1x1x64x24xbf16>
    %139 = vector.shape_cast %138 : vector<1x1x64x24xbf16> to vector<64x24xbf16>
    %140 = arith.extf %139 : vector<64x24xbf16> to vector<64x24xf32>
    %c0_72 = arith.constant 0 : index
    %c2_73 = arith.constant 2 : index
    %c0_74 = arith.constant 0 : index
    %c0_75 = arith.constant 0 : index
    %141 = vector.load %arg3[%c0_72, %c2_73, %c0_74, %c0_75] : memref<1x4x8x24xbf16, #tpu.memory_space<vmem>>, vector<1x1x8x24xbf16>
    %142 = vector.shape_cast %141 : vector<1x1x8x24xbf16> to vector<8x24xbf16>
    %143 = arith.extf %142 : vector<8x24xbf16> to vector<8x24xf32>
    %c0_76 = arith.constant 0 : index
    %c2_77 = arith.constant 2 : index
    %c0_78 = arith.constant 0 : index
    %c0_79 = arith.constant 0 : index
    %144 = vector.load %arg4[%c0_76, %c2_77, %c0_78, %c0_79] : memref<1x4x64x24xbf16, #tpu.memory_space<vmem>>, vector<1x1x64x24xbf16>
    %145 = vector.shape_cast %144 : vector<1x1x64x24xbf16> to vector<64x24xbf16>
    %146 = arith.extf %145 : vector<64x24xbf16> to vector<64x24xf32>
    %c2_80 = arith.constant 2 : index
    %c0_81 = arith.constant 0 : index
    %c0_82 = arith.constant 0 : index
    %147 = vector.load %arg5[%c2_80, %c0_81, %c0_82] : memref<4x8x24xf32, #tpu.memory_space<vmem>>, vector<1x8x24xf32>
    %148 = vector.shape_cast %147 : vector<1x8x24xf32> to vector<8x24xf32>
    %149 = arith.mulf %137, %137 : vector<8x24xf32>
    %cst_83 = arith.constant dense<0.000000e+00> : vector<8xf32>
    %150 = vector.multi_reduction <add>, %149, %cst_83 [1] : vector<8x24xf32> to vector<8xf32>
    %151 = vector.shape_cast %150 : vector<8xf32> to vector<8x1xf32>
    %152 = math.sqrt %151 : vector<8x1xf32>
    %cst_84 = arith.constant 9.99999996E-13 : f32
    %153 = vector.broadcast %cst_84 : f32 to vector<8x1xf32>
    %154 = arith.maximumf %152, %153 : vector<8x1xf32>
    %155 = vector.broadcast %154 : vector<8x1xf32> to vector<8x24xf32>
    %156 = arith.divf %137, %155 : vector<8x24xf32>
    %157 = arith.mulf %140, %140 : vector<64x24xf32>
    %cst_85 = arith.constant dense<0.000000e+00> : vector<64xf32>
    %158 = vector.multi_reduction <add>, %157, %cst_85 [1] : vector<64x24xf32> to vector<64xf32>
    %159 = vector.shape_cast %158 : vector<64xf32> to vector<64x1xf32>
    %160 = math.sqrt %159 : vector<64x1xf32>
    %cst_86 = arith.constant 9.99999996E-13 : f32
    %161 = vector.broadcast %cst_86 : f32 to vector<64x1xf32>
    %162 = arith.maximumf %160, %161 : vector<64x1xf32>
    %163 = vector.broadcast %162 : vector<64x1xf32> to vector<64x24xf32>
    %164 = arith.divf %140, %163 : vector<64x24xf32>
    "tpu.trace_start"() <{level = 10 : i32, message = "mc,nc->mn"}> : () -> ()
    %cst_87 = arith.constant dense<0.000000e+00> : vector<8x64xf32>
    %165 = tpu.matmul %156, %164, %cst_87 {dimension_numbers = #tpu.dot_dimension_numbers<[1], [1], [0], [0], [0, 0, 1, 0], [], []>} : vector<8x24xf32>, vector<64x24xf32>, vector<8x64xf32> -> vector<8x64xf32>
    "tpu.trace_stop"() : () -> ()
    %166 = vector.broadcast %1 : f32 to vector<8x64xf32>
    %167 = arith.mulf %166, %165 : vector<8x64xf32>
    %168 = vector.broadcast %0 : f32 to vector<8x64xf32>
    %169 = arith.addf %168, %167 : vector<8x64xf32>
    %170 = arith.negf %169 : vector<8x64xf32>
    %171 = math.exp %170 : vector<8x64xf32>
    %cst_88 = arith.constant 1.000000e+00 : f32
    %172 = vector.broadcast %cst_88 : f32 to vector<8x64xf32>
    %173 = arith.addf %172, %171 : vector<8x64xf32>
    %174 = arith.divf %172, %173 : vector<8x64xf32>
    %175 = tpu.iota {dimensions = array<i32: 0>} : vector<8x64xi32>
    %cst_89 = arith.constant dense<0xFF800000> : vector<64xf32>
    %176 = vector.multi_reduction <maximumf>, %174, %cst_89 [0] : vector<8x64xf32> to vector<64xf32>
    %177 = vector.shape_cast %176 : vector<64xf32> to vector<1x64xf32>
    %178 = vector.broadcast %177 : vector<1x64xf32> to vector<8x64xf32>
    %179 = arith.cmpf oge, %174, %178 : vector<8x64xf32>
    %c8_i32_90 = arith.constant 8 : i32
    %180 = vector.broadcast %c8_i32_90 : i32 to vector<8x64xi32>
    %181 = arith.select %179, %175, %180 : vector<8x64xi1>, vector<8x64xi32>
    %cst_91 = arith.constant dense<2147483647> : vector<64xi32>
    %182 = vector.multi_reduction <minsi>, %181, %cst_91 [0] : vector<8x64xi32> to vector<64xi32>
    %183 = vector.shape_cast %182 : vector<64xi32> to vector<1x64xi32>
    %184 = vector.broadcast %183 : vector<1x64xi32> to vector<8x64xi32>
    %185 = arith.cmpi eq, %175, %184 : vector<8x64xi32>
    %186 = arith.extui %185 : vector<8x64xi1> to vector<8x64xi32>
    %187 = arith.sitofp %186 : vector<8x64xi32> to vector<8x64xf32>
    %188 = arith.mulf %174, %187 : vector<8x64xf32>
    %cst_92 = arith.constant dense<0.000000e+00> : vector<8x24xf32>
    %189 = tpu.matmul %188, %146, %cst_92 {dimension_numbers = #tpu.dot_dimension_numbers<[1], [0], [0], [1], [0, 0, 1, 1], [], []>} : vector<8x64xf32>, vector<64x24xf32>, vector<8x24xf32> -> vector<8x24xf32>
    %190 = arith.addf %189, %143 : vector<8x24xf32>
    %cst_93 = arith.constant dense<0.000000e+00> : vector<8xf32>
    %191 = vector.multi_reduction <add>, %188, %cst_93 [1] : vector<8x64xf32> to vector<8xf32>
    %192 = vector.shape_cast %191 : vector<8xf32> to vector<8x1xf32>
    %cst_94 = arith.constant 1.000000e+00 : f32
    %193 = vector.broadcast %cst_94 : f32 to vector<8x1xf32>
    %194 = arith.addf %192, %193 : vector<8x1xf32>
    %195 = tpu.reciprocal %194 {approx = true} : vector<8x1xf32> -> vector<8x1xf32>
    %196 = vector.broadcast %195 : vector<8x1xf32> to vector<8x24xf32>
    %197 = arith.mulf %190, %196 : vector<8x24xf32>
    "tpu.trace_start"() <{level = 10 : i32, message = "mc,mn->cn"}> : () -> ()
    %cst_95 = arith.constant dense<0.000000e+00> : vector<24x64xf32>
    %198 = tpu.matmul %197, %188, %cst_95 {dimension_numbers = #tpu.dot_dimension_numbers<[0], [0], [1], [1], [0, 1, 1, 1], [], []>} : vector<8x24xf32>, vector<8x64xf32>, vector<24x64xf32> -> vector<24x64xf32>
    "tpu.trace_stop"() : () -> ()
    %cst_96 = arith.constant dense<0.000000e+00> : vector<8x64xf32>
    %199 = tpu.matmul %148, %198, %cst_96 {dimension_numbers = #tpu.dot_dimension_numbers<[1], [0], [0], [1], [0, 0, 1, 1], [], []>} : vector<8x24xf32>, vector<24x64xf32>, vector<8x64xf32> -> vector<8x64xf32>
    %200 = arith.addf %134, %199 : vector<8x64xf32>
    %c0_97 = arith.constant 0 : index
    %c3 = arith.constant 3 : index
    %c0_98 = arith.constant 0 : index
    %c0_99 = arith.constant 0 : index
    %201 = vector.load %arg1[%c0_97, %c3, %c0_98, %c0_99] : memref<1x4x8x24xbf16, #tpu.memory_space<vmem>>, vector<1x1x8x24xbf16>
    %202 = vector.shape_cast %201 : vector<1x1x8x24xbf16> to vector<8x24xbf16>
    %203 = arith.extf %202 : vector<8x24xbf16> to vector<8x24xf32>
    %c0_100 = arith.constant 0 : index
    %c3_101 = arith.constant 3 : index
    %c0_102 = arith.constant 0 : index
    %c0_103 = arith.constant 0 : index
    %204 = vector.load %arg2[%c0_100, %c3_101, %c0_102, %c0_103] : memref<1x4x64x24xbf16, #tpu.memory_space<vmem>>, vector<1x1x64x24xbf16>
    %205 = vector.shape_cast %204 : vector<1x1x64x24xbf16> to vector<64x24xbf16>
    %206 = arith.extf %205 : vector<64x24xbf16> to vector<64x24xf32>
    %c0_104 = arith.constant 0 : index
    %c3_105 = arith.constant 3 : index
    %c0_106 = arith.constant 0 : index
    %c0_107 = arith.constant 0 : index
    %207 = vector.load %arg3[%c0_104, %c3_105, %c0_106, %c0_107] : memref<1x4x8x24xbf16, #tpu.memory_space<vmem>>, vector<1x1x8x24xbf16>
    %208 = vector.shape_cast %207 : vector<1x1x8x24xbf16> to vector<8x24xbf16>
    %209 = arith.extf %208 : vector<8x24xbf16> to vector<8x24xf32>
    %c0_108 = arith.constant 0 : index
    %c3_109 = arith.constant 3 : index
    %c0_110 = arith.constant 0 : index
    %c0_111 = arith.constant 0 : index
    %210 = vector.load %arg4[%c0_108, %c3_109, %c0_110, %c0_111] : memref<1x4x64x24xbf16, #tpu.memory_space<vmem>>, vector<1x1x64x24xbf16>
    %211 = vector.shape_cast %210 : vector<1x1x64x24xbf16> to vector<64x24xbf16>
    %212 = arith.extf %211 : vector<64x24xbf16> to vector<64x24xf32>
    %c3_112 = arith.constant 3 : index
    %c0_113 = arith.constant 0 : index
    %c0_114 = arith.constant 0 : index
    %213 = vector.load %arg5[%c3_112, %c0_113, %c0_114] : memref<4x8x24xf32, #tpu.memory_space<vmem>>, vector<1x8x24xf32>
    %214 = vector.shape_cast %213 : vector<1x8x24xf32> to vector<8x24xf32>
    %215 = arith.mulf %203, %203 : vector<8x24xf32>
    %cst_115 = arith.constant dense<0.000000e+00> : vector<8xf32>
    %216 = vector.multi_reduction <add>, %215, %cst_115 [1] : vector<8x24xf32> to vector<8xf32>
    %217 = vector.shape_cast %216 : vector<8xf32> to vector<8x1xf32>
    %218 = math.sqrt %217 : vector<8x1xf32>
    %cst_116 = arith.constant 9.99999996E-13 : f32
    %219 = vector.broadcast %cst_116 : f32 to vector<8x1xf32>
    %220 = arith.maximumf %218, %219 : vector<8x1xf32>
    %221 = vector.broadcast %220 : vector<8x1xf32> to vector<8x24xf32>
    %222 = arith.divf %203, %221 : vector<8x24xf32>
    %223 = arith.mulf %206, %206 : vector<64x24xf32>
    %cst_117 = arith.constant dense<0.000000e+00> : vector<64xf32>
    %224 = vector.multi_reduction <add>, %223, %cst_117 [1] : vector<64x24xf32> to vector<64xf32>
    %225 = vector.shape_cast %224 : vector<64xf32> to vector<64x1xf32>
    %226 = math.sqrt %225 : vector<64x1xf32>
    %cst_118 = arith.constant 9.99999996E-13 : f32
    %227 = vector.broadcast %cst_118 : f32 to vector<64x1xf32>
    %228 = arith.maximumf %226, %227 : vector<64x1xf32>
    %229 = vector.broadcast %228 : vector<64x1xf32> to vector<64x24xf32>
    %230 = arith.divf %206, %229 : vector<64x24xf32>
    "tpu.trace_start"() <{level = 10 : i32, message = "mc,nc->mn"}> : () -> ()
    %cst_119 = arith.constant dense<0.000000e+00> : vector<8x64xf32>
    %231 = tpu.matmul %222, %230, %cst_119 {dimension_numbers = #tpu.dot_dimension_numbers<[1], [1], [0], [0], [0, 0, 1, 0], [], []>} : vector<8x24xf32>, vector<64x24xf32>, vector<8x64xf32> -> vector<8x64xf32>
    "tpu.trace_stop"() : () -> ()
    %232 = vector.broadcast %1 : f32 to vector<8x64xf32>
    %233 = arith.mulf %232, %231 : vector<8x64xf32>
    %234 = vector.broadcast %0 : f32 to vector<8x64xf32>
    %235 = arith.addf %234, %233 : vector<8x64xf32>
    %236 = arith.negf %235 : vector<8x64xf32>
    %237 = math.exp %236 : vector<8x64xf32>
    %cst_120 = arith.constant 1.000000e+00 : f32
    %238 = vector.broadcast %cst_120 : f32 to vector<8x64xf32>
    %239 = arith.addf %238, %237 : vector<8x64xf32>
    %240 = arith.divf %238, %239 : vector<8x64xf32>
    %241 = tpu.iota {dimensions = array<i32: 0>} : vector<8x64xi32>
    %cst_121 = arith.constant dense<0xFF800000> : vector<64xf32>
    %242 = vector.multi_reduction <maximumf>, %240, %cst_121 [0] : vector<8x64xf32> to vector<64xf32>
    %243 = vector.shape_cast %242 : vector<64xf32> to vector<1x64xf32>
    %244 = vector.broadcast %243 : vector<1x64xf32> to vector<8x64xf32>
    %245 = arith.cmpf oge, %240, %244 : vector<8x64xf32>
    %c8_i32_122 = arith.constant 8 : i32
    %246 = vector.broadcast %c8_i32_122 : i32 to vector<8x64xi32>
    %247 = arith.select %245, %241, %246 : vector<8x64xi1>, vector<8x64xi32>
    %cst_123 = arith.constant dense<2147483647> : vector<64xi32>
    %248 = vector.multi_reduction <minsi>, %247, %cst_123 [0] : vector<8x64xi32> to vector<64xi32>
    %249 = vector.shape_cast %248 : vector<64xi32> to vector<1x64xi32>
    %250 = vector.broadcast %249 : vector<1x64xi32> to vector<8x64xi32>
    %251 = arith.cmpi eq, %241, %250 : vector<8x64xi32>
    %252 = arith.extui %251 : vector<8x64xi1> to vector<8x64xi32>
    %253 = arith.sitofp %252 : vector<8x64xi32> to vector<8x64xf32>
    %254 = arith.mulf %240, %253 : vector<8x64xf32>
    %cst_124 = arith.constant dense<0.000000e+00> : vector<8x24xf32>
    %255 = tpu.matmul %254, %212, %cst_124 {dimension_numbers = #tpu.dot_dimension_numbers<[1], [0], [0], [1], [0, 0, 1, 1], [], []>} : vector<8x64xf32>, vector<64x24xf32>, vector<8x24xf32> -> vector<8x24xf32>
    %256 = arith.addf %255, %209 : vector<8x24xf32>
    %cst_125 = arith.constant dense<0.000000e+00> : vector<8xf32>
    %257 = vector.multi_reduction <add>, %254, %cst_125 [1] : vector<8x64xf32> to vector<8xf32>
    %258 = vector.shape_cast %257 : vector<8xf32> to vector<8x1xf32>
    %cst_126 = arith.constant 1.000000e+00 : f32
    %259 = vector.broadcast %cst_126 : f32 to vector<8x1xf32>
    %260 = arith.addf %258, %259 : vector<8x1xf32>
    %261 = tpu.reciprocal %260 {approx = true} : vector<8x1xf32> -> vector<8x1xf32>
    %262 = vector.broadcast %261 : vector<8x1xf32> to vector<8x24xf32>
    %263 = arith.mulf %256, %262 : vector<8x24xf32>
    "tpu.trace_start"() <{level = 10 : i32, message = "mc,mn->cn"}> : () -> ()
    %cst_127 = arith.constant dense<0.000000e+00> : vector<24x64xf32>
    %264 = tpu.matmul %263, %254, %cst_127 {dimension_numbers = #tpu.dot_dimension_numbers<[0], [0], [1], [1], [0, 1, 1, 1], [], []>} : vector<8x24xf32>, vector<8x64xf32>, vector<24x64xf32> -> vector<24x64xf32>
    "tpu.trace_stop"() : () -> ()
    %cst_128 = arith.constant dense<0.000000e+00> : vector<8x64xf32>
    %265 = tpu.matmul %214, %264, %cst_128 {dimension_numbers = #tpu.dot_dimension_numbers<[1], [0], [0], [1], [0, 0, 1, 1], [], []>} : vector<8x24xf32>, vector<24x64xf32>, vector<8x64xf32> -> vector<8x64xf32>
    %266 = arith.addf %200, %265 : vector<8x64xf32>
    %c0_129 = arith.constant 0 : index
    %c0_130 = arith.constant 0 : index
    %267 = vector.load %arg6[%c0_129, %c0_130] : memref<8x1xf32, #tpu.memory_space<vmem>>, vector<8x1xf32>
    %268 = vector.broadcast %267 : vector<8x1xf32> to vector<8x64xf32>
    %269 = arith.addf %266, %268 : vector<8x64xf32>
    %c0_131 = arith.constant 0 : index
    %c0_132 = arith.constant 0 : index
    %c0_133 = arith.constant 0 : index
    %270 = vector.load %arg8[%c0_131, %c0_132, %c0_133] : memref<1x8x64xf32, #tpu.memory_space<vmem>>, vector<1x8x64xf32>
    %271 = vector.shape_cast %270 : vector<1x8x64xf32> to vector<8x64xf32>
    %272 = vector.shape_cast %269 : vector<8x64xf32> to vector<1x8x64xf32>
    tpu.vector_store %arg8[%c0_131, %c0_132, %c0_133], %272 {strides = array<i32>} : memref<1x8x64xf32, #tpu.memory_space<vmem>>, vector<1x8x64xf32>,
    return
  }
  func.func @transform_0(%arg0: i32) -> (i32, i32, i32, i32) {
    %c0_i32 = arith.constant 0 : i32
    %c0_i32_0 = arith.constant 0 : i32
    %c0_i32_1 = arith.constant 0 : i32
    %c0_i32_2 = arith.constant 0 : i32
    return %arg0, %c0_i32, %c0_i32_0, %c0_i32_1 : i32, i32, i32, i32
  }
  func.func @transform_1(%arg0: i32) -> (i32, i32, i32, i32) {
    %c0_i32 = arith.constant 0 : i32
    %c0_i32_0 = arith.constant 0 : i32
    %c0_i32_1 = arith.constant 0 : i32
    %c0_i32_2 = arith.constant 0 : i32
    return %arg0, %c0_i32, %c0_i32_0, %c0_i32_1 : i32, i32, i32, i32
  }
  func.func @transform_2(%arg0: i32) -> (i32, i32, i32, i32) {
    %c0_i32 = arith.constant 0 : i32
    %c0_i32_0 = arith.constant 0 : i32
    %c0_i32_1 = arith.constant 0 : i32
    %c0_i32_2 = arith.constant 0 : i32
    return %arg0, %c0_i32, %c0_i32_0, %c0_i32_1 : i32, i32, i32, i32
  }
  func.func @transform_3(%arg0: i32) -> (i32, i32, i32, i32) {
    %c0_i32 = arith.constant 0 : i32
    %c0_i32_0 = arith.constant 0 : i32
    %c0_i32_1 = arith.constant 0 : i32
    %c0_i32_2 = arith.constant 0 : i32
    return %arg0, %c0_i32, %c0_i32_0, %c0_i32_1 : i32, i32, i32, i32
  }
  func.func @transform_4(%arg0: i32) -> (i32, i32, i32) {
    %c0_i32 = arith.constant 0 : i32
    %c0_i32_0 = arith.constant 0 : i32
    %c0_i32_1 = arith.constant 0 : i32
    %c0_i32_2 = arith.constant 0 : i32
    return %c0_i32, %c0_i32_0, %c0_i32_1 : i32, i32, i32
  }
  func.func @transform_5(%arg0: i32) -> (i32, i32) {
    %c0_i32 = arith.constant 0 : i32
    %c0_i32_0 = arith.constant 0 : i32
    %c0_i32_1 = arith.constant 0 : i32
    return %c0_i32, %c0_i32_0 : i32, i32
  }
  func.func @transform_6(%arg0: i32) -> i32 {
    %c0_i32 = arith.constant 0 : i32
    %c0_i32_0 = arith.constant 0 : i32
    return %c0_i32 : i32
  }
  func.func @transform_7(%arg0: i32) -> (i32, i32, i32) {
    %c0_i32 = arith.constant 0 : i32
    %c0_i32_0 = arith.constant 0 : i32
    %c0_i32_1 = arith.constant 0 : i32
    return %arg0, %c0_i32, %c0_i32_0 : i32, i32, i32
  }
}

</mosaic_0001>

<bundles_post_ra>
// kernel: cross_cluster_forward.4
= control target key start
LH: loop header
LB: loop body
LE: loop exit
PB: predicated region body
PF: predicated region fallthrough
CT: control target
= control target key end

     0   :  { %vm118_vm0 = vcmask 1041408   ;;  %v418_v1 = vmov 0   ;;  %vm93_vm1 = vcmask 31744   ;;  %v34_v12 = vlaneseq  ;;  %s597_s1 = inlined_call_operand.vmem [shape: bf16[4,192], index: 1, kind: input, shape index: {}]   ;;  %s598_s0 = inlined_call_operand.vmem [shape: bf16[128,4], index: 0, kind: input, shape index: {}]   ;;  %s599_s2 = inlined_call_operand.vmem [shape: f32[1,192], index: 2, kind: input, shape index: {}]   ;;  %s600_s3 = inlined_call_operand.vmem [shape: bf16[128,192], index: 3, kind: output, shape index: {}]  }
   0x1   :  { %v365_v0 = vld.sshfl [vmem:[%s597_s1] sm:$0x33 pattern:$0x76325410]  ;;  %157 = vmatprep.mubr.bf16.mxu0 %v418_v1  ;;  %197 = vmatprep.mubr.bf16.mxu1 %v418_v1  ;;  %v412_v6 = vld [vmem:[%s598_s0 + $0x8] sm:$0xff]   ;;  %v414_v8 = vld [vmem:[%s598_s0 + $0x10] sm:$0xff]  }
   0x2   :  { %v92_v2 = vcombine.high %v365_v0, %v365_v0  ;;  %v120_v3 = vsel %vm118_vm0, %v365_v0, 0  ;;  %v410_v4 = vld [vmem:[%s598_s0] sm:$0xff]   ;;  %v413_v7 = vld [vmem:[%s598_s0 + $0x28] sm:$0xff]   ;;  %v415_v9 = vld [vmem:[%s598_s0 + $0x30] sm:$0xff]   ;;  %v35_v13 = vshrl.u32 %v34_v12, 7  ;;  %vm334_vm2 = vcmask 1043456  }
   0x3   :  { %v411_v5 = vld [vmem:[%s598_s0 + $0x20] sm:$0xff]   ;;  %v416_v10 = vld [vmem:[%s598_s0 + $0x18] sm:$0xff]   ;;  %vm335_vm3 = vcmask 523268  }
   0x4   :  { %366 = vmatprep.subr.msk.bf16.mxu0 %vm118_vm0, %v92_v2  ;;  %407 = vmatprep.subr.msk.bf16.mxu1 %vm118_vm0, %v92_v2  ;;  %v417_v11 = vld [vmem:[%s598_s0 + $0x38] sm:$0xff]   ;;  %v36_v14 = vsub.s32 0, %v35_v13  ;;  %v40_v15 = vsub.s32 1, %v35_v13  ;;  %v32_v16 = vld [vmem:[%s599_s2] sm:$0x3]  ;;  %vm485_vm4 = vmor %vm335_vm3, %vm334_vm2 }
   0x5   :  { %140 = vmatpush1.bf16.msra.mxu0 %v120_v3  ;;  %408 = vmatpush1.bf16.msra.mxu1 %v120_v3 }
   0x6   :  { %v477_v17 = vrot.slane %v32_v16, %v36_v14  ;;  %v479_v18 = vrot.slane %v32_v16, %v40_v15 }
   0x8   :  { %367 = vmatmul.mubr.msk.bf16.vlgmr.msra.gmra.mxu0 %vm93_vm1, %v410_v4  ;;  %371 = vmatmul.mubr.msk.bf16.vlgmr.msra.gmra.mxu1 %vm93_vm1, %v411_v5 }
   0x9   :  { %167 = vmatprep.mubr.bf16.mxu0 %v418_v1  ;;  %207 = vmatprep.mubr.bf16.mxu1 %v418_v1 }
  0x10   :  { %368 = vmatmul.mubr.msk.bf16.gmra.mxu0 %vm93_vm1, %v412_v6  ;;  %372 = vmatmul.mubr.msk.bf16.gmra.mxu1 %vm93_vm1, %v413_v7 }
  0x11   :  { %177 = vmatprep.mubr.bf16.mxu0 %v418_v1  ;;  %217 = vmatprep.mubr.bf16.mxu1 %v418_v1 }
  0x18   :  { %369 = vmatmul.mubr.msk.bf16.gmra.mxu0 %vm93_vm1, %v414_v8  ;;  %373 = vmatmul.mubr.msk.bf16.gmra.mxu1 %vm93_vm1, %v415_v9 }
  0x19   :  { %187 = vmatprep.mubr.bf16.mxu0 %v418_v1  ;;  %227 = vmatprep.mubr.bf16.mxu1 %v418_v1 }
  0x20   :  { %370 = vmatmul.mubr.msk.bf16.gmra.mxu0 %vm93_vm1, %v416_v10  ;;  %374 = vmatmul.mubr.msk.bf16.gmra.mxu1 %vm93_vm1, %v417_v11 }
  0xc8   :  { %v159_v19 = vpop.f32.mrf.mxu0  ;;  %v199_v20 = vpop.f32.mrf.mxu1 }
  0xc9   :  { %v160_v23 = vadd.f32 %v159_v19, %v477_v17  ;;  %v200_v24 = vadd.f32 %v199_v20, %v477_v17 }
  0xca   :  { %v161_v21 = vpop.f32.mrf.mxu0  ;;  %v201_v22 = vpop.f32.mrf.mxu1 }
  0xcb   :  { %v162_v25 = vadd.f32 %v161_v21, %v479_v18  ;;  %v202_v26 = vadd.f32 %v201_v22, %v479_v18 }
  0xcc   :  { %v163_v28 = vpop.f32.mrf.mxu0  ;;  %v203_v29 = vpop.f32.mrf.mxu1 }
  0xcd   :  { %v391_v30 = vpack.c.bf16 %v162_v25, %v160_v23  ;;  %v399_v31 = vpack.c.bf16 %v202_v26, %v200_v24  ;;  %v164_v34 = vadd.f32 %v163_v28, %v477_v17  ;;  %v204_v35 = vadd.f32 %v203_v29, %v477_v17 }
  0xce   :  { %v165_v32 = vpop.f32.mrf.mxu0  ;;  %v205_v33 = vpop.f32.mrf.mxu1 }
  0xcf   :  { %337 = vst.msk [vmem:[%s600_s3] sm:$0xff] %vm485_vm4, %v391_v30  ;;  %345 = vst.msk [vmem:[%s600_s3 + $0x40] sm:$0xff] %vm485_vm4, %v399_v31  ;;  %v166_v36 = vadd.f32 %v165_v32, %v479_v18  ;;  %v206_v37 = vadd.f32 %v205_v33, %v479_v18 }
  0xd0   :  { %v169_v38 = vpop.f32.mrf.mxu0  ;;  %v209_v39 = vpop.f32.mrf.mxu1 }
  0xd1   :  { %v392_v40 = vpack.c.bf16 %v166_v36, %v164_v34  ;;  %v400_v41 = vpack.c.bf16 %v206_v37, %v204_v35  ;;  %v170_v44 = vadd.f32 %v169_v38, %v477_v17  ;;  %v210_v45 = vadd.f32 %v209_v39, %v477_v17 }
  0xd2   :  { %v171_v42 = vpop.f32.mrf.mxu0  ;;  %v211_v43 = vpop.f32.mrf.mxu1 }
  0xd3   :  { %338 = vst.msk [vmem:[%s600_s3 + $0x8] sm:$0xff] %vm485_vm4, %v392_v40  ;;  %346 = vst.msk [vmem:[%s600_s3 + $0x48] sm:$0xff] %vm485_vm4, %v400_v41  ;;  %v172_v46 = vadd.f32 %v171_v42, %v479_v18  ;;  %v212_v47 = vadd.f32 %v211_v43, %v479_v18 }
  0xd4   :  { %v173_v48 = vpop.f32.mrf.mxu0  ;;  %v213_v49 = vpop.f32.mrf.mxu1 }
  0xd5   :  { %v393_v50 = vpack.c.bf16 %v172_v46, %v170_v44  ;;  %v401_v51 = vpack.c.bf16 %v212_v47, %v210_v45  ;;  %v174_v54 = vadd.f32 %v173_v48, %v477_v17  ;;  %v214_v55 = vadd.f32 %v213_v49, %v477_v17 }
  0xd6   :  { %v175_v52 = vpop.f32.mrf.mxu0  ;;  %v215_v53 = vpop.f32.mrf.mxu1 }
  0xd7   :  { %339 = vst.msk [vmem:[%s600_s3 + $0x10] sm:$0xff] %vm485_vm4, %v393_v50  ;;  %347 = vst.msk [vmem:[%s600_s3 + $0x50] sm:$0xff] %vm485_vm4, %v401_v51  ;;  %v176_v56 = vadd.f32 %v175_v52, %v479_v18  ;;  %v216_v57 = vadd.f32 %v215_v53, %v479_v18 }
  0xd8   :  { %v179_v58 = vpop.f32.mrf.mxu0  ;;  %v219_v59 = vpop.f32.mrf.mxu1 }
  0xd9   :  { %v394_v60 = vpack.c.bf16 %v176_v56, %v174_v54  ;;  %v402_v61 = vpack.c.bf16 %v216_v57, %v214_v55  ;;  %v180_v0 = vadd.f32 %v179_v58, %v477_v17  ;;  %v220_v1 = vadd.f32 %v219_v59, %v477_v17 }
  0xda   :  { %v181_v62 = vpop.f32.mrf.mxu0  ;;  %v221_v63 = vpop.f32.mrf.mxu1 }
  0xdb   :  { %340 = vst.msk [vmem:[%s600_s3 + $0x18] sm:$0xff] %vm485_vm4, %v394_v60  ;;  %348 = vst.msk [vmem:[%s600_s3 + $0x58] sm:$0xff] %vm485_vm4, %v402_v61  ;;  %v182_v2 = vadd.f32 %v181_v62, %v479_v18  ;;  %v222_v3 = vadd.f32 %v221_v63, %v479_v18 }
  0xdc   :  { %v183_v4 = vpop.f32.mrf.mxu0  ;;  %v223_v5 = vpop.f32.mrf.mxu1 }
  0xdd   :  { %v395_v6 = vpack.c.bf16 %v182_v2, %v180_v0  ;;  %v403_v7 = vpack.c.bf16 %v222_v3, %v220_v1  ;;  %v184_v10 = vadd.f32 %v183_v4, %v477_v17  ;;  %v224_v11 = vadd.f32 %v223_v5, %v477_v17 }
  0xde   :  { %v185_v8 = vpop.f32.mrf.mxu0  ;;  %v225_v9 = vpop.f32.mrf.mxu1 }
  0xdf   :  { %341 = vst.msk [vmem:[%s600_s3 + $0x20] sm:$0xff] %vm485_vm4, %v395_v6  ;;  %349 = vst.msk [vmem:[%s600_s3 + $0x60] sm:$0xff] %vm485_vm4, %v403_v7  ;;  %v186_v12 = vadd.f32 %v185_v8, %v479_v18  ;;  %v226_v13 = vadd.f32 %v225_v9, %v479_v18 }
  0xe0   :  { %v189_v14 = vpop.f32.mrf.mxu0  ;;  %v229_v15 = vpop.f32.mrf.mxu1 }
  0xe1   :  { %v396_v16 = vpack.c.bf16 %v186_v12, %v184_v10  ;;  %v404_v19 = vpack.c.bf16 %v226_v13, %v224_v11  ;;  %v190_v22 = vadd.f32 %v189_v14, %v477_v17  ;;  %v230_v23 = vadd.f32 %v229_v15, %v477_v17 }
  0xe2   :  { %v191_v20 = vpop.f32.mrf.mxu0  ;;  %v231_v21 = vpop.f32.mrf.mxu1 }
  0xe3   :  { %342 = vst.msk [vmem:[%s600_s3 + $0x28] sm:$0xff] %vm485_vm4, %v396_v16  ;;  %350 = vst.msk [vmem:[%s600_s3 + $0x68] sm:$0xff] %vm485_vm4, %v404_v19  ;;  %v192_v24 = vadd.f32 %v191_v20, %v479_v18  ;;  %v232_v25 = vadd.f32 %v231_v21, %v479_v18 }
  0xe4   :  { %v193_v26 = vpop.f32.mrf.mxu0  ;;  %v233_v28 = vpop.f32.mrf.mxu1 }
  0xe5   :  { %v397_v29 = vpack.c.bf16 %v192_v24, %v190_v22  ;;  %v405_v30 = vpack.c.bf16 %v232_v25, %v230_v23  ;;  %v194_v33 = vadd.f32 %v193_v26, %v477_v17  ;;  %v234_v34 = vadd.f32 %v233_v28, %v477_v17 }
  0xe6   :  { %v195_v31 = vpop.f32.mrf.mxu0  ;;  %v235_v32 = vpop.f32.mrf.mxu1 }
  0xe7   :  { %343 = vst.msk [vmem:[%s600_s3 + $0x30] sm:$0xff] %vm485_vm4, %v397_v29  ;;  %351 = vst.msk [vmem:[%s600_s3 + $0x70] sm:$0xff] %vm485_vm4, %v405_v30  ;;  %v196_v35 = vadd.f32 %v195_v31, %v479_v18  ;;  %v236_v36 = vadd.f32 %v235_v32, %v479_v18 }
  0xe9   :  { %v398_v37 = vpack.c.bf16 %v196_v35, %v194_v33  ;;  %v406_v38 = vpack.c.bf16 %v236_v36, %v234_v34 }
  0xeb   :  { %344 = vst.msk [vmem:[%s600_s3 + $0x38] sm:$0xff] %vm485_vm4, %v398_v37  ;;  %352 = vst.msk [vmem:[%s600_s3 + $0x78] sm:$0xff] %vm485_vm4, %v406_v38 }

// kernel: cross_cluster_forward.5
= control target key start
LH: loop header
LB: loop body
LE: loop exit
PB: predicated region body
PF: predicated region fallthrough
CT: control target
= control target key end

     0   :  { %12 = vsyncpa [#allocation3], 0  ;;  %s3645_s24 = smov 0   ;;  %s4317_s0 = inlined_call_operand.vmem [shape: bf16[2,4,8,24], index: 0, kind: input, shape index: {}]   ;;  %s4318_s1 = inlined_call_operand.vmem [shape: bf16[2,4,64,24], index: 1, kind: input, shape index: {}]   ;;  %s4319_s2 = inlined_call_operand.vmem [shape: bf16[2,4,8,24], index: 2, kind: input, shape index: {}]   ;;  %s4320_s3 = inlined_call_operand.vmem [shape: bf16[2,4,64,24], index: 3, kind: input, shape index: {}]   ;;  %s4321_s4 = inlined_call_operand.vmem [shape: f32[4,8,24], index: 4, kind: input, shape index: {}]   ;;  %s4322_s5 = inlined_call_operand.vmem [shape: f32[8,1], index: 5, kind: input, shape index: {}]   ;;  %s4323_s6 = inlined_call_operand.vmem [shape: f32[2], index: 6, kind: input, shape index: {}]   ;;  %s4324_s7 = inlined_call_operand.vmem [shape: f32[2,8,64], index: 7, kind: output, shape index: {}]  }
   0x1 LB: > { %s2742_s25 = sadd.s32 4294967295, %s3599_s24   ;;  %p2744_p0 = scmp.ge.s32.totalorder %s3599_s24, 1  ;;  %s3599_s24 = sphi %s3645_s24, %s18_s24  }
   0x2   : > { %p216_p1 = scmp.lt.s32.totalorder %s3599_s24, 3  ;;  %s235_s28 = sshll.u32 %s4323_s6, 4  ;;  %s236_s28 = int_to_ptr.vmem [resolvable:$true] %s235_s28 }
   0x3   : > { %p3390_p3 = scmp.eq.s32.totalorder %s2742_s25, 0  ;;  %s3574_s30 = scalar_lea.vmem %s236_s28, 16 }
   0x4   : > { %p3656_p2 = pnand %p2744_p0, %p216_p1  ;;  %p3575_p6 = scmp.ne.s32.totalorder %s236_s28, %s3574_s30 }
   0x5   : > { %p3582_p10 = scmp.lt.s32.totalorder %s236_s28, %s236_s28  ;;  %p3583_p11 = scmp.lt.s32.totalorder %s3574_s30, %s3574_s30 }
   0x6   : > { %p3386_p4 = pneg %p3656_p2 }
   0x7   : > { %p3584_p12 = por %p3583_p11, %p3582_p10 }
   0x8   : > { %p3387_p5 = pnand %p3390_p3, %p3386_p4 }
   0xa   : > { %p3576_p7 = pneg %p3387_p5 }
   0xc   : > { %p3577_p8 = pnand %p3576_p7, %p3575_p6 }
   0xe   : > { %p3578_p9 = pneg %p3577_p8 }
  0x10   : > { %p3585_p13 = pnand %p3584_p12, %p3578_p9 }
  0x12   : > { %3588 = shalt.err (!%p3585_p13)
}
  0x13   : > { %s3601_s8 = smov [#allocation2]   ;;  %280 = sbr.rel (%p3656_p2) target bundleno = 3210 (0xc8a), region = 48 }
  0x14   : > { %3389 = dma.vmem_to_smem (!%p3387_p5), %s236_s28, 16, %s3601_s8, [#allocation3]  }
  0x18   : > { %3594 = dma.done.wait (%p3390_p3), [#allocation3], 16  }
  0x19   : > { %3596 = vsyncadd (%p3390_p3), [#allocation3], 4294967280 }
  0x1a   : > { %286 = sfence }
  0x1b   : > { %p327_p0 = scmp.lt.s32.totalorder %s2742_s25, 1  ;;  %vm391_vm0 = vcmask 195584   ;;  %v3602_v32 = vmov 0.0   ;;  %vm3603_vm1 = vmmov 0   ;;  %s2758_s20 = sld [smem:[#allocation2 + $0x1]] }
  0x1c   : > { %3148 = vmatprep.subr.mxu0 %v3602_v32  ;;  %3167 = vmatprep.subr.mxu1 %v3602_v32  ;;  %s351_s21 = sld [smem:[#allocation2]] }
  0x1d   : > { %s4327_s25 = smov (!%p327_p0, %s2742_s25), 1  ;;  %3164 = vmatprep.mubr.msk.f32.mxu0 %vm3603_vm1, %v3602_v32  ;;  %3183 = vmatprep.mubr.msk.f32.mxu1 %vm3603_vm1, %v3602_v32 }
  0x1e   : > { %s2883_s9 = sshll.u32 %s4327_s25, 7  ;;  %s2882_s13 = sshll.u32 %s4327_s25, 4 }
  0x1f   : > { %s3675_s12 = scalar_lea.vmem %s4318_s1, %s2883_s9  ;;  %s3709_s16 = scalar_lea.vmem %s4317_s0, %s2882_s13 }
  0x20   : > { %v3016_v0 = vld [vmem:[%s3675_s12 + $0x18] sm:$0xff]   ;;  %v3015_v1 = vld [vmem:[%s3675_s12 + $0x10] sm:$0xff]   ;;  %v3014_v2 = vld [vmem:[%s3675_s12 + $0x8] sm:$0xff]   ;;  %s3809_s19 = scalar_lea.vmem %s4320_s3, %s2883_s9  ;;  %s3896_s26 = scalar_lea.vmem %s4319_s2, %s2882_s13 }
  0x21   : > { %v3680_v3 = vunpack.c.h.bf16 %v3016_v0  ;;  %v3682_v4 = vunpack.c.h.bf16 %v3015_v1  ;;  %v3684_v5 = vunpack.c.l.bf16 %v3016_v0  ;;  %v3686_v6 = vunpack.c.l.bf16 %v3015_v1  ;;  %v2887_v13 = vld [vmem:[%s3675_s12] sm:$0xff]   ;;  %s2757_s14 = sshll.u32 %s4327_s25, 3 }
  0x22   : > { %v3688_v7 = vunpack.c.h.bf16 %v3014_v2  ;;  %v3690_v8 = vunpack.c.l.bf16 %v3014_v2  ;;  %v3711_v16 = vunpack.c.h.bf16 %v2887_v13  ;;  %v3713_v17 = vunpack.c.l.bf16 %v2887_v13  ;;  %v3722_v22 = vld [vmem:[%s3709_s16] sm:$0xff]   ;;  %s350_s17 = scalar_lea.vmem %s4324_s7, %s2757_s14 }
  0x23   : > { %v412_v9 = vmul.f32 %v3680_v3, %v3680_v3  ;;  %v410_v10 = vmul.f32 %v3682_v4, %v3682_v4  ;;  %v411_v11 = vmul.f32 %v3684_v5, %v3684_v5  ;;  %v409_v12 = vmul.f32 %v3686_v6, %v3686_v6 }
  0x24   : > { %v408_v20 = vmul.f32 %v3688_v7, %v3688_v7  ;;  %v407_v21 = vmul.f32 %v3690_v8, %v3690_v8  ;;  %v406_v23 = vmul.f32 %v3711_v16, %v3711_v16  ;;  %v405_v26 = vmul.f32 %v3713_v17, %v3713_v17 }
  0x25   : > { %v434_v14 = vsel %vm391_vm0, %v412_v9, 0.0  ;;  %v428_v15 = vsel %vm391_vm0, %v410_v10, 0.0  ;;  %v431_v18 = vsel %vm391_vm0, %v411_v11, 0.0  ;;  %v425_v19 = vsel %vm391_vm0, %v409_v12, 0.0 }
  0x26   : > { %435 = vadd.xlane.f32.xlu0 %v434_v14  ;;  %429 = vadd.xlane.f32.xlu1 %v428_v15  ;;  %v422_v24 = vsel %vm391_vm0, %v408_v20, 0.0  ;;  %v419_v25 = vsel %vm391_vm0, %v407_v21, 0.0  ;;  %v3731_v27 = vunpack.c.l.bf16 %v3722_v22  ;;  %v416_v28 = vsel %vm391_vm0, %v406_v23, 0.0 }
  0x27   : > { %v413_v29 = vsel %vm391_vm0, %v405_v26, 0.0 }
  0x28   : > { %v390_v30 = vmul.f32 %v3731_v27, %v3731_v27 }
  0x2a   : > { %432 = vadd.xlane.f32.xlu0 %v431_v18  ;;  %426 = vadd.xlane.f32.xlu1 %v425_v19  ;;  %v392_v31 = vsel %vm391_vm0, %v390_v30, 0.0 }
  0x2e   : > { %423 = vadd.xlane.f32.xlu0 %v422_v24  ;;  %420 = vadd.xlane.f32.xlu1 %v419_v25 }
  0x32   : > { %417 = vadd.xlane.f32.xlu0 %v416_v28  ;;  %414 = vadd.xlane.f32.xlu1 %v413_v29 }
  0x36   : > { %393 = vadd.xlane.f32.xlu0 %v392_v31 }
  0xaf   : > { %v436_v33 = vpop.xlane.xlu0 %435  ;;  %v430_v34 = vpop.xlane.xlu1 %429 }
  0xb0   : > { %3406 = vrsqrt.f32 %v436_v33  ;;  %vm488_vm2 = vcmp.eq.f32.partialorder %v436_v33, inf  ;;  %v491_v44 = vand.u32 2147483648, %v436_v33  ;;  %vm490_vm3 = vcmp.eq.f32.partialorder %v436_v33, 0.0 }
  0xb1   : > { %3408 = vrsqrt.f32 %v430_v34  ;;  %vm474_vm4 = vcmp.eq.f32.partialorder %v430_v34, inf  ;;  %v477_v51 = vand.u32 2147483648, %v430_v34  ;;  %vm476_vm5 = vcmp.eq.f32.partialorder %v430_v34, 0.0 }
  0xb3   : > { %v433_v35 = vpop.xlane.xlu0 %432  ;;  %v427_v36 = vpop.xlane.xlu1 %426 }
  0xb4   : > { %3410 = vrsqrt.f32 %v433_v35  ;;  %vm481_vm6 = vcmp.eq.f32.partialorder %v433_v35, inf  ;;  %v484_v56 = vand.u32 2147483648, %v433_v35  ;;  %vm483_vm7 = vcmp.eq.f32.partialorder %v433_v35, 0.0 }
  0xb5   : > { %3412 = vrsqrt.f32 %v427_v36  ;;  %vm467_vm8 = vcmp.eq.f32.partialorder %v427_v36, inf  ;;  %v470_v62 = vand.u32 2147483648, %v427_v36  ;;  %vm469_vm9 = vcmp.eq.f32.partialorder %v427_v36, 0.0 }
  0xb7   : > { %v424_v37 = vpop.xlane.xlu0 %423  ;;  %v3744_v38 = vpop.xlane.xlu1 %420 }
  0xb8   : > { %3414 = vrsqrt.f32 %v424_v37  ;;  %vm460_vm10 = vcmp.eq.f32.partialorder %v424_v37, inf  ;;  %v463_v13 = vand.u32 2147483648, %v424_v37  ;;  %vm462_vm11 = vcmp.eq.f32.partialorder %v424_v37, 0.0 }
  0xb9   : > { %3416 = vrsqrt.f32 %v3744_v38  ;;  %vm453_vm12 = vcmp.eq.f32.partialorder %v3744_v38, inf  ;;  %v456_v21 = vand.u32 2147483648, %v3744_v38  ;;  %vm455_vm13 = vcmp.eq.f32.partialorder %v3744_v38, 0.0 }
  0xbb   : > { %v3747_v39 = vpop.xlane.xlu0 %417  ;;  %v3750_v41 = vpop.xlane.xlu1 %414 }
  0xbc   : > { %3418 = vrsqrt.f32 %v3747_v39  ;;  %vm446_vm14 = vcmp.eq.f32.partialorder %v3747_v39, inf  ;;  %v449_v30 = vand.u32 2147483648, %v3747_v39  ;;  %vm439_vm15 = vcmp.eq.f32.partialorder %v3750_v41, inf }
  0xbd   : > { %v3407_v40 = vpop.eup %3406  ;;  %3420 = vrsqrt.f32 %v3750_v41 }
  0xbe   : > { %v3409_v42 = vpop.eup %3408  ;;  %v487_v43 = vmul.f32 %v3407_v40, %v436_v33 }
  0xbf   : > { %v473_v45 = vmul.f32 %v3409_v42, %v430_v34  ;;  %v3753_v47 = vpop.xlane.xlu0 %393 }
  0xc0   : > { %v489_v46 = vsel %vm488_vm2, %v436_v33, %v487_v43  ;;  %3422 = vrsqrt.f32 %v3753_v47  ;;  %vm448_vm2 = vcmp.eq.f32.partialorder %v3747_v39, 0.0 }
  0xc1   : > { %v3411_v48 = vpop.eup %3410  ;;  %v492_v49 = vsel %vm490_vm3, %v491_v44, %v489_v46  ;;  %v475_v50 = vsel %vm474_vm4, %v430_v34, %v473_v45  ;;  %vm441_vm3 = vcmp.eq.f32.partialorder %v3750_v41, 0.0  ;;  %vm397_vm4 = vcmp.eq.f32.partialorder %v3753_v47, inf }
  0xc2   : > { %v3413_v52 = vpop.eup %3412  ;;  %v500_v53 = vmax.f32 %v492_v49, 1e-12  ;;  %v480_v54 = vmul.f32 %v3411_v48, %v433_v35  ;;  %v478_v55 = vsel %vm476_vm5, %v477_v51, %v475_v50  ;;  %vm399_vm5 = vcmp.eq.f32.partialorder %v3753_v47, 0.0 }
  0xc3   : > { %v466_v57 = vmul.f32 %v3413_v52, %v427_v36  ;;  %v498_v0 = vmax.f32 %v478_v55, 1e-12 }
  0xc4   : > { %3424 = vrcp.f32 %v500_v53  ;;  %v482_v58 = vsel %vm481_vm6, %v433_v35, %v480_v54  ;;  %v442_v35 = vand.u32 2147483648, %v3750_v41  ;;  %vm626_vm6 = vcmask 523264  }
  0xc5   : > { %v3415_v59 = vpop.eup %3414  ;;  %v485_v60 = vsel %vm483_vm7, %v484_v56, %v482_v58  ;;  %v468_v61 = vsel %vm467_vm8, %v427_v36, %v466_v57  ;;  %v3017_v57 = vld [vmem:[%s3809_s19 + $0x8] sm:$0xff]  }
  0xc6   : > { %v3417_v63 = vpop.eup %3416  ;;  %v499_v1 = vmax.f32 %v485_v60, 1e-12  ;;  %v459_v2 = vmul.f32 %v3415_v59, %v424_v37  ;;  %v471_v9 = vsel %vm469_vm9, %v470_v62, %v468_v61  ;;  %v2909_v59 = vunpack.c.h.bf16 %v3017_v57  ;;  %v2903_v60 = vld [vmem:[%s3809_s19] sm:$0xff]  }
  0xc7   : > { %v452_v11 = vmul.f32 %v3417_v63, %v3744_v38  ;;  %v497_v14 = vmax.f32 %v471_v9, 1e-12  ;;  %v2908_v61 = vunpack.c.l.bf16 %v3017_v57  ;;  %v2905_v62 = vunpack.c.h.bf16 %v2903_v60 }
  0xc8   : > { %3426 = vrcp.f32 %v499_v1  ;;  %v461_v10 = vsel %vm460_vm10, %v424_v37, %v459_v2  ;;  %v2904_v63 = vunpack.c.l.bf16 %v2903_v60 }
  0xc9   : > { %v3419_v12 = vpop.eup %3418  ;;  %3428 = vrcp.f32 %v498_v0  ;;  %v464_v15 = vsel %vm462_vm11, %v463_v13, %v461_v10  ;;  %v454_v18 = vsel %vm453_vm12, %v3744_v38, %v452_v11  ;;  %v3023_v0 = vld [vmem:[%s3675_s12 + $0x38] sm:$0xff]   ;;  %v3829_v10 = vstv %s2758_s20 }
  0xca   : > { %v445_v19 = vmul.f32 %v3419_v12, %v3747_v39  ;;  %v3421_v20 = vpop.eup %3420  ;;  %3430 = vrcp.f32 %v497_v14  ;;  %v496_v23 = vmax.f32 %v464_v15, 1e-12  ;;  %v457_v24 = vsel %vm455_vm13, %v456_v21, %v454_v18 }
  0xcb   : > { %v438_v28 = vmul.f32 %v3421_v20, %v3750_v41  ;;  %v495_v31 = vmax.f32 %v457_v24, 1e-12  ;;  %v3824_v1 = vunpack.c.h.bf16 %v3023_v0  ;;  %v3831_v12 = vstv %s351_s21 }
  0xcc   : > { %v447_v26 = vsel %vm446_vm14, %v3747_v39, %v445_v19  ;;  %3432 = vrcp.f32 %v496_v23 }
  0xcd   : > { %v3423_v25 = vpop.eup %3422  ;;  %v450_v34 = vsel %vm448_vm2, %v449_v30, %v447_v26  ;;  %v440_v37 = vsel %vm439_vm15, %v3750_v41, %v438_v28  ;;  %3434 = vrcp.f32 %v495_v31  ;;  %v914_v2 = vmul.f32 %v3824_v1, %v3824_v1 }
  0xce   : > { %v396_v36 = vmul.f32 %v3423_v25, %v3753_v47  ;;  %v494_v39 = vmax.f32 %v450_v34, 1e-12  ;;  %v443_v43 = vsel %vm441_vm3, %v442_v35, %v440_v37  ;;  %v624_v28 = vlaneseq }
  0xcf   : > { %v493_v41 = vmax.f32 %v443_v43, 1e-12  ;;  %v936_v9 = vsel %vm391_vm0, %v914_v2, 0.0  ;;  %v3022_v43 = vld [vmem:[%s3675_s12 + $0x30] sm:$0xff]  }
  0xd0   : > { %v398_v44 = vsel %vm397_vm4, %v3753_v47, %v396_v36  ;;  %3436 = vrcp.f32 %v494_v39  ;;  %937 = vadd.xlane.f32.xlu0 %v936_v9  ;;  %v3836_v31 = vshrl.u32 %v624_v28, 7 }
  0xd1   : > { %v3425_v29 = vpop.eup %3424  ;;  %3438 = vrcp.f32 %v493_v41 }
  0xd2   : > { %v516_v33 = vmul.f32 %v3425_v29, %v3680_v3  ;;  %v400_v3 = vand.u32 2147483648, %v3753_v47 }
  0xd4   : > { %3149 = vmatpush3.xpose.msk.msra.mxu0 %vm391_vm0, %v516_v33  ;;  %v401_v45 = vsel %vm399_vm5, %v400_v3, %v398_v44 }
  0xd5   : > { %v3427_v38 = vpop.eup %3426  ;;  %3150 = vmatprep.subr.mxu0 %v3602_v32  ;;  %v402_v49 = vmax.f32 %v401_v45, 1e-12 }
  0xd6   : > { %v514_v40 = vmul.f32 %v3427_v38, %v3684_v5  ;;  %v3429_v42 = vpop.eup %3428 }
  0xd7   : > { %v512_v46 = vmul.f32 %v3429_v42, %v3682_v4  ;;  %v3431_v48 = vpop.eup %3430  ;;  %3440 = vrcp.f32 %v402_v49 }
  0xd8   : > { %3151 = vmatpush3.xpose.msk.msra.mxu0 %vm391_vm0, %v514_v40  ;;  %v510_v5 = vmul.f32 %v3431_v48, %v3686_v6  ;;  %v3840_v40 = vunpack.c.l.bf16 %v3023_v0  ;;  %v3021_v48 = vld [vmem:[%s3675_s12 + $0x28] sm:$0xff]  }
  0xd9   : > { %3152 = vmatprep.subr.mxu0 %v3602_v32  ;;  %v3433_v50 = vpop.eup %3432 }
  0xda   : > { %v508_v47 = vmul.f32 %v3433_v50, %v3688_v7  ;;  %v3435_v51 = vpop.eup %3434  ;;  %v913_v45 = vmul.f32 %v3840_v40, %v3840_v40 }
  0xdb   : > { %v506_v4 = vmul.f32 %v3435_v51, %v3690_v8  ;;  %v3019_v8 = vld [vmem:[%s3809_s19 + $0x18] sm:$0xff]   ;;  %v3020_v51 = vld [vmem:[%s3675_s12 + $0x20] sm:$0xff]  }
  0xdc   : > { %3153 = vmatpush3.xpose.msk.msra.mxu0 %vm391_vm0, %v512_v46  ;;  %v3847_v46 = vunpack.c.l.bf16 %v3022_v43 }
  0xdd   : > { %3154 = vmatprep.subr.mxu0 %v3602_v32  ;;  %v3437_v52 = vpop.eup %3436 }
  0xde   : > { %v504_v6 = vmul.f32 %v3437_v52, %v3711_v16  ;;  %v3439_v53 = vpop.eup %3438  ;;  %v3018_v16 = vld [vmem:[%s3809_s19 + $0x10] sm:$0xff]   ;;  %v911_v50 = vmul.f32 %v3847_v46, %v3847_v46 }
  0xdf   : > { %v502_v54 = vmul.f32 %v3439_v53, %v3713_v17  ;;  %v2916_v17 = vunpack.c.l.bf16 %v3019_v8  ;;  %v2913_v56 = vunpack.c.h.bf16 %v3018_v16  ;;  %v2912_v58 = vunpack.c.l.bf16 %v3018_v16 }
  0xe0   : > { %3155 = vmatpush3.xpose.msk.msra.mxu0 %vm391_vm0, %v510_v5  ;;  %v933_v5 = vsel %vm391_vm0, %v913_v45, 0.0  ;;  %v3866_v53 = vunpack.c.h.bf16 %v3022_v43  ;;  %v3874_v16 = vunpack.c.h.bf16 %v3021_v48 }
  0xe1   : > { %3156 = vmatprep.subr.mxu0 %v3602_v32 }
  0xe4   : > { %3157 = vmatpush3.xpose.msk.msra.mxu0 %vm391_vm0, %v508_v47  ;;  %v3441_v7 = vpop.eup %3440  ;;  %v3855_v47 = vunpack.c.l.bf16 %v3021_v48 }
  0xe5   : > { %3158 = vmatprep.subr.mxu0 %v3602_v32  ;;  %v404_v55 = vmul.f32 %v3441_v7, %v3731_v27  ;;  %v2917_v27 = vunpack.c.h.bf16 %v3019_v8 }
  0xe6   : > { %v909_v52 = vmul.f32 %v3855_v47, %v3855_v47 }
  0xe7   : > { %3168 = vmatpush3.msra.mxu1 %v2917_v27 }
  0xe8   : > { %3159 = vmatpush3.xpose.msk.msra.mxu0 %vm391_vm0, %v506_v4  ;;  %3169 = vmatprep.subr.mxu1 %v3602_v32  ;;  %v927_v4 = vsel %vm391_vm0, %v911_v50, 0.0  ;;  %v921_v7 = vsel %vm391_vm0, %v909_v52, 0.0 }
  0xe9   : > { %3160 = vmatprep.subr.mxu0 %v3602_v32  ;;  %3170 = vmatpush3.msra.mxu1 %v2916_v17  ;;  %v3876_v17 = vunpack.c.h.bf16 %v3020_v51 }
  0xea   : > { %3171 = vmatprep.subr.mxu1 %v3602_v32 }
  0xeb   : > { %3172 = vmatpush3.msra.mxu1 %v2913_v56  ;;  %v910_v56 = vmul.f32 %v3874_v16, %v3874_v16  ;;  %v908_v57 = vmul.f32 %v3876_v17, %v3876_v17 }
  0xec   : > { %3161 = vmatpush3.xpose.msk.msra.mxu0 %vm391_vm0, %v504_v6  ;;  %3173 = vmatprep.subr.mxu1 %v3602_v32  ;;  %v3864_v6 = vunpack.c.l.bf16 %v3020_v51 }
  0xed   : > { %3162 = vmatprep.subr.mxu0 %v3602_v32  ;;  %3174 = vmatpush3.msra.mxu1 %v2912_v58  ;;  %v3884_v58 = vunpack.c.h.bf16 %v3722_v22  ;;  %v918_v60 = vsel %vm391_vm0, %v908_v57, 0.0  ;;  %v3899_v22 = vld [vmem:[%s3896_s26] sm:$0xff]  }
  0xee   : > { %3175 = vmatprep.subr.mxu1 %v3602_v32  ;;  %v372_v2 = vunpack.c.l.bf16 %v3899_v22 }
  0xef   : > { %3176 = vmatpush3.msra.mxu1 %v2909_v59  ;;  %v924_v59 = vsel %vm391_vm0, %v910_v56, 0.0 }
  0xf0   : > { %3163 = vmatpush3.xpose.msk.msra.mxu0 %vm391_vm0, %v502_v54  ;;  %3177 = vmatprep.subr.mxu1 %v3602_v32  ;;  %v907_v54 = vmul.f32 %v3864_v6, %v3864_v6 }
  0xf1   : > { %3216 = vmatprep.subr.mxu0 %v3602_v32  ;;  %3178 = vmatpush3.msra.mxu1 %v2908_v61  ;;  %v893_v61 = vmul.f32 %v3884_v58, %v3884_v58 }
  0xf2   : > { %3179 = vmatprep.subr.mxu1 %v3602_v32  ;;  %v915_v27 = vsel %vm391_vm0, %v907_v54, 0.0 }
  0xf3   : > { %3165 = vmatmul.mubr.msk.f32.vlgmr.msra.gmra.mxu0 %vm391_vm0, %v404_v55  ;;  %3180 = vmatpush3.msra.mxu1 %v2905_v62  ;;  %v912_v55 = vmul.f32 %v3866_v53, %v3866_v53  ;;  %v894_v62 = vsel %vm391_vm0, %v893_v61, 0.0 }
  0xf4   : > { %3232 = vmatprep.mubr.msk.f32.mxu0 %vm3603_vm1, %v3602_v32  ;;  %3181 = vmatprep.subr.mxu1 %v3602_v32 }
  0xf5   : > { %3182 = vmatpush3.msra.mxu1 %v2904_v63  ;;  %v930_v8 = vsel %vm391_vm0, %v912_v55, 0.0 }
  0xf6   : > { %3186 = vmatprep.subr.mxu1 %v3602_v32  ;;  %931 = vadd.xlane.f32.xlu0 %v930_v8 }
  0xfa   : > { %925 = vadd.xlane.f32.xlu0 %v924_v59 }
  0xfe   : > { %919 = vadd.xlane.f32.xlu0 %v918_v60 }
 0x102   : > { %895 = vadd.xlane.f32.xlu0 %v894_v62 }
 0x1b3   : > { %v610_v11 = vpop.f32.mrf.mxu0 }
 0x1b4   : > { %v615_v13 = vmul.f32 %v3829_v10, %v610_v11 }
 0x1b5   : > { %v3166_v14 = vpop.f32.mrf.mxu0 }
 0x1b6   : > { %v617_v15 = vadd.f32 %v3831_v12, %v615_v13 }
 0x1b8   : > { %v2768_v18 = vmul.f32 -1.442695, %v617_v15 }
 0x1ba   : > { %3442 = vpow2.f32 %v2768_v18  ;;  %v938_v18 = vpop.xlane.xlu0 %937 }
 0x1bb   : > { %vm990_vm12 = vcmp.eq.f32.partialorder %v938_v18, inf  ;;  %vm992_vm13 = vcmp.eq.f32.partialorder %v938_v18, 0.0 }
 0x1c7   : > { %v3443_v19 = vpop.eup %3442 }
 0x1c8   : > { %v621_v20 = vadd.f32 1.0, %v3443_v19 }
 0x1ca   : > { %3444 = vrcp.f32 %v621_v20  ;;  %v932_v20 = vpop.xlane.xlu0 %931 }
 0x1cb   : > { %vm976_vm2 = vcmp.eq.f32.partialorder %v932_v20, inf  ;;  %vm978_vm3 = vcmp.eq.f32.partialorder %v932_v20, 0.0 }
 0x1d7   : > { %v3445_v21 = vpop.eup %3444 }
 0x1d8   : > { %v627_v23 = vsel %vm626_vm6, %v3445_v21, -inf }
 0x1d9   : > { %v628_v24 = vrot.slane %v627_v23, 4 }
 0x1db   : > { %v629_v25 = vmax.f32 %v627_v23, %v628_v24  ;;  %v926_v24 = vpop.xlane.xlu0 %925 }
 0x1dd   : > { %v630_v26 = vrot.slane %v629_v25, 2 }
 0x1df   : > { %v631_v29 = vmax.f32 %v629_v25, %v630_v26 }
 0x1e1   : > { %v632_v30 = vrot.slane %v631_v29, 1 }
 0x1e3   : > { %v633_v33 = vmax.f32 %v631_v29, %v632_v30  ;;  %v993_v29 = vand.u32 2147483648, %v938_v18 }
 0x1e5   : > { %vm634_vm7 = vcmp.ge.f32.partialorder %v3445_v21, %v633_v33 }
 0x1e6   : > { %v635_v34 = vsel %vm634_vm7, %v3836_v31, 8  ;;  %vm962_vm7 = vcmp.eq.f32.partialorder %v926_v24, inf }
 0x1e7   : > { %v636_v35 = vsel %vm626_vm6, %v635_v34, 2147483647 }
 0x1e8   : > { %v637_v36 = vrot.slane %v636_v35, 4 }
 0x1ea   : > { %vm638_vm8 = vcmp.lt.s32.totalorder %v636_v35, %v637_v36 }
 0x1eb   : > { %v639_v37 = vsel %vm638_vm8, %v636_v35, %v637_v36  ;;  %v3902_v35 = vpop.xlane.xlu0 %919  ;;  %vm964_vm8 = vcmp.eq.f32.partialorder %v926_v24, 0.0 }
 0x1ec   : > { %v640_v38 = vrot.slane %v639_v37, 2 }
 0x1ee   : > { %vm641_vm9 = vcmp.lt.s32.totalorder %v639_v37, %v640_v38 }
 0x1ef   : > { %v642_v39 = vsel %vm641_vm9, %v639_v37, %v640_v38 }
 0x1f0   : > { %v643_v3 = vrot.slane %v642_v39, 1 }
 0x1f2   : > { %vm644_vm10 = vcmp.lt.s32.totalorder %v642_v39, %v643_v3 }
 0x1f3   : > { %v645_v42 = vsel %vm644_vm10, %v642_v39, %v643_v3 }
 0x1f4   : > { %vm646_vm11 = vcmp.eq.s32.totalorder %v3836_v31, %v645_v42 }
 0x1f5   : > { %v2769_v44 = vsel %vm646_vm11, 1.0, %v3602_v32  ;;  %vm948_vm11 = vcmp.eq.f32.partialorder %v3902_v35, inf }
 0x1f6   : > { %v649_v41 = vmul.f32 %v3445_v21, %v2769_v44 }
 0x1f8   : > { %3184 = vmatmul.mubr.msk.f32.vlgmr.msra.gmra.mxu1 %vm626_vm6, %v649_v41  ;;  %v723_v49 = vsel %vm626_vm6, %v649_v41, 0.0 }
 0x1f9   : > { %3187 = vmatpush3.msra.mxu1 %v649_v41  ;;  %724 = vadd.xlane.f32.xlu1 %v723_v49  ;;  %v979_v41 = vand.u32 2147483648, %v932_v20  ;;  %v3908_v49 = vpop.xlane.xlu0 %895 }
 0x1fa   : > { %3188 = vmatprep.mubr.msk.f32.mxu1 %vm3603_vm1, %v3602_v32  ;;  %3197 = vmatprep.subr.mxu1 %v3602_v32 }
 0x1fd   : > { %934 = vadd.xlane.f32.xlu1 %v933_v5 }
 0x201   : > { %928 = vadd.xlane.f32.xlu1 %v927_v4 }
 0x205   : > { %922 = vadd.xlane.f32.xlu1 %v921_v7 }
 0x209   : > { %916 = vadd.xlane.f32.xlu1 %v915_v27  ;;  %v965_v27 = vand.u32 2147483648, %v926_v24 }
 0x282   : > { %v725_v63 = vpop.xlane.xlu1 %724 }
 0x283   : > { %v726_v0 = vadd.f32 1.0, %v725_v63 }
 0x285   : > { %3446 = vrcp.f32 %v726_v0 }
 0x286   : > { %3448 = vrsqrt.f32 %v938_v18  ;;  %v935_v19 = vpop.xlane.xlu1 %934 }
 0x287   : > { %3450 = vrsqrt.f32 %v935_v19  ;;  %vm983_vm14 = vcmp.eq.f32.partialorder %v935_v19, inf  ;;  %v986_v36 = vand.u32 2147483648, %v935_v19  ;;  %vm985_vm15 = vcmp.eq.f32.partialorder %v935_v19, 0.0 }
 0x288   : > { %3452 = vrsqrt.f32 %v932_v20 }
 0x28a   : > { %v929_v21 = vpop.xlane.xlu1 %928 }
 0x28b   : > { %3454 = vrsqrt.f32 %v929_v21  ;;  %vm969_vm4 = vcmp.eq.f32.partialorder %v929_v21, inf  ;;  %v972_v51 = vand.u32 2147483648, %v929_v21  ;;  %vm971_vm5 = vcmp.eq.f32.partialorder %v929_v21, 0.0 }
 0x28c   : > { %3456 = vrsqrt.f32 %v926_v24 }
 0x28e   : > { %v923_v28 = vpop.xlane.xlu1 %922 }
 0x28f   : > { %3458 = vrsqrt.f32 %v923_v28  ;;  %vm955_vm9 = vcmp.eq.f32.partialorder %v923_v28, inf  ;;  %v958_v61 = vand.u32 2147483648, %v923_v28  ;;  %vm957_vm10 = vcmp.eq.f32.partialorder %v923_v28, 0.0 }
 0x290   : > { %3460 = vrsqrt.f32 %v3902_v35 }
 0x292   : > { %v3447_v13 = vpop.eup %3446  ;;  %v3905_v42 = vpop.xlane.xlu1 %916 }
 0x293   : > { %v3449_v23 = vpop.eup %3448  ;;  %3462 = vrsqrt.f32 %v3905_v42 }
 0x294   : > { %v989_v25 = vmul.f32 %v3449_v23, %v938_v18  ;;  %v3451_v26 = vpop.eup %3450 }
 0x295   : > { %v982_v30 = vmul.f32 %v3451_v26, %v935_v19  ;;  %v3453_v34 = vpop.eup %3452 }
 0x296   : > { %v991_v33 = vsel %vm990_vm12, %v938_v18, %v989_v25  ;;  %v975_v39 = vmul.f32 %v3453_v34, %v932_v20  ;;  %vm950_vm12 = vcmp.eq.f32.partialorder %v3902_v35, 0.0  ;;  %v944_v25 = vand.u32 2147483648, %v3905_v42 }
 0x297   : > { %v994_v37 = vsel %vm992_vm13, %v993_v29, %v991_v33  ;;  %v984_v38 = vsel %vm983_vm14, %v935_v19, %v982_v30  ;;  %vm761_vm13 = vcmask 64512   ;;  %vm941_vm14 = vcmp.eq.f32.partialorder %v3905_v42, inf }
 0x298   : > { %v3455_v3 = vpop.eup %3454  ;;  %v1002_v43 = vmax.f32 %v994_v37, 1e-12  ;;  %v987_v44 = vsel %vm985_vm15, %v986_v36, %v984_v38  ;;  %v977_v48 = vsel %vm976_vm2, %v932_v20, %v975_v39  ;;  %vm943_vm15 = vcmp.eq.f32.partialorder %v3905_v42, 0.0 }
 0x299   : > { %v968_v45 = vmul.f32 %v3455_v3, %v929_v21  ;;  %v3457_v5 = vpop.eup %3456  ;;  %v1001_v50 = vmax.f32 %v987_v44, 1e-12  ;;  %v980_v4 = vsel %vm978_vm3, %v979_v41, %v977_v48  ;;  %vm899_vm2 = vcmp.eq.f32.partialorder %v3908_v49, inf }
 0x29a   : > { %3464 = vrcp.f32 %v1002_v43  ;;  %v961_v7 = vmul.f32 %v3457_v5, %v926_v24  ;;  %v1000_v55 = vmax.f32 %v980_v4, 1e-12  ;;  %v902_v30 = vand.u32 2147483648, %v3908_v49 }
 0x29b   : > { %3466 = vrsqrt.f32 %v3908_v49  ;;  %v970_v52 = vsel %vm969_vm4, %v929_v21, %v968_v45  ;;  %vm901_vm3 = vcmp.eq.f32.partialorder %v3908_v49, 0.0 }
 0x29c   : > { %v3459_v54 = vpop.eup %3458  ;;  %3468 = vrcp.f32 %v1001_v50  ;;  %v973_v8 = vsel %vm971_vm5, %v972_v51, %v970_v52  ;;  %v963_v57 = vsel %vm962_vm7, %v926_v24, %v961_v7  ;;  %v3026_v51 = vld [vmem:[%s3809_s19 + $0x30] sm:$0xff]  }
 0x29d   : > { %v954_v56 = vmul.f32 %v3459_v54, %v923_v28  ;;  %v3461_v59 = vpop.eup %3460  ;;  %v999_v60 = vmax.f32 %v973_v8, 1e-12  ;;  %3470 = vrcp.f32 %v1000_v55  ;;  %v966_v62 = vsel %vm964_vm8, %v965_v27, %v963_v57  ;;  %v3024_v55 = vld [vmem:[%s3809_s19 + $0x20] sm:$0xff]  }
 0x29e   : > { %v947_v0 = vmul.f32 %v3461_v59, %v3902_v35  ;;  %v2945_v7 = vunpack.c.h.bf16 %v3026_v51  ;;  %v2944_v54 = vunpack.c.l.bf16 %v3026_v51  ;;  %v2937_v27 = vunpack.c.h.bf16 %v3024_v55 }
 0x29f   : > { %v956_v63 = vsel %vm955_vm9, %v923_v28, %v954_v56  ;;  %3472 = vrcp.f32 %v999_v60  ;;  %v2936_v56 = vunpack.c.l.bf16 %v3024_v55 }
 0x2a0   : > { %v949_v19 = vsel %vm948_vm11, %v3902_v35, %v947_v0 }
 0x2b8   : > { %v719_v9 = vpop.f32.mrf.mxu1 }
 0x2b9   : > { %v720_v11 = vadd.f32 %v719_v9, %v372_v2  ;;  %v3463_v2 = vpop.eup %3462  ;;  %v998_v9 = vmax.f32 %v966_v62, 1e-12 }
 0x2ba   : > { %v3185_v14 = vpop.f32.mrf.mxu1  ;;  %v940_v18 = vmul.f32 %v3463_v2, %v3905_v42 }
 0x2bb   : > { %v728_v15 = vmul.f32 %v3447_v13, %v720_v11  ;;  %v3465_v11 = vpop.eup %3464  ;;  %v959_v13 = vsel %vm957_vm10, %v958_v61, %v956_v63  ;;  %v951_v14 = vand.u32 2147483648, %v3902_v35  ;;  %3474 = vrcp.f32 %v998_v9 }
 0x2bc   : > { %v997_v20 = vmax.f32 %v959_v13, 1e-12  ;;  %v1018_v23 = vmul.f32 %v3465_v11, %v3824_v1  ;;  %v942_v29 = vsel %vm941_vm14, %v3905_v42, %v940_v18 }
 0x2bd   : > { %729 = vxpose.xlu1.b32.start.end [1/1] (short) (narrow) %v728_v15, 24  ;;  %v3467_v15 = vpop.eup %3466  ;;  %v952_v26 = vsel %vm950_vm12, %v951_v14, %v949_v19  ;;  %v945_v36 = vsel %vm943_vm15, %v944_v25, %v942_v29 }
 0x2be   : > { %v3469_v24 = vpop.eup %3468  ;;  %v898_v28 = vmul.f32 %v3467_v15, %v3908_v49  ;;  %3476 = vrcp.f32 %v997_v20  ;;  %v996_v1 = vmax.f32 %v952_v26, 1e-12  ;;  %v995_v38 = vmax.f32 %v945_v36, 1e-12 }
 0x2bf   : > { %v1016_v33 = vmul.f32 %v3469_v24, %v3840_v40  ;;  %v3471_v35 = vpop.eup %3470 }
 0x2c0   : > { %v900_v37 = vsel %vm899_vm2, %v3908_v49, %v898_v28  ;;  %3478 = vrcp.f32 %v996_v1  ;;  %v1014_v40 = vmul.f32 %v3471_v35, %v3866_v53  ;;  %v3473_v42 = vpop.eup %3472 }
 0x2c1   : > { %v903_v39 = vsel %vm901_vm3, %v902_v30, %v900_v37  ;;  %3480 = vrcp.f32 %v995_v38  ;;  %v1012_v44 = vmul.f32 %v3473_v42, %v3847_v46  ;;  %v873_v42 = vunpack.c.h.bf16 %v3899_v22 }
 0x2c2   : > { %v904_v43 = vmax.f32 %v903_v39, 1e-12 }
 0x2c4   : > { %3482 = vrcp.f32 %v904_v43 }
 0x2c8   : > { %v3475_v41 = vpop.eup %3474 }
 0x2c9   : > { %v1010_v53 = vmul.f32 %v3475_v41, %v3874_v16 }
 0x2cb   : > { %v3477_v45 = vpop.eup %3476 }
 0x2cc   : > { %v1008_v48 = vmul.f32 %v3477_v45, %v3855_v47 }
 0x2cd   : > { %v3479_v49 = vpop.eup %3478 }
 0x2ce   : > { %v1006_v46 = vmul.f32 %v3479_v49, %v3876_v17  ;;  %v3481_v5 = vpop.eup %3480  ;;  %v3027_v17 = vld [vmem:[%s3809_s19 + $0x38] sm:$0xff]   ;;  %v3030_v49 = vld [vmem:[%s3675_s12 + $0x50] sm:$0xff]  }
 0x2cf   : > { %v1004_v50 = vmul.f32 %v3481_v5, %v3864_v6  ;;  %v2949_v4 = vunpack.c.h.bf16 %v3027_v17  ;;  %v2948_v52 = vunpack.c.l.bf16 %v3027_v17  ;;  %v3025_v6 = vld [vmem:[%s3809_s19 + $0x28] sm:$0xff]   ;;  %v3999_v5 = vunpack.c.h.bf16 %v3030_v49 }
 0x2d0   : > { %v2940_v8 = vunpack.c.l.bf16 %v3025_v6  ;;  %v3029_v17 = vld [vmem:[%s3675_s12 + $0x48] sm:$0xff]  }
 0x2d1   : > { %v3483_v16 = vpop.eup %3482  ;;  %3217 = vmatpush3.msra.mxu0 %v2949_v4  ;;  %v1554_v22 = vmul.f32 %v3999_v5, %v3999_v5 }
 0x2d2   : > { %v906_v47 = vmul.f32 %v3483_v16, %v3884_v58  ;;  %3218 = vmatprep.subr.mxu0 %v3602_v32  ;;  %v2941_v58 = vunpack.c.h.bf16 %v3025_v6 }
 0x2d3   : > { %3219 = vmatpush3.msra.mxu0 %v2948_v52  ;;  %v1572_v51 = vsel %vm391_vm0, %v1554_v22, 0.0  ;;  %v4012_v52 = vunpack.c.l.bf16 %v3029_v17 }
 0x2d4   : > { %3220 = vmatprep.subr.mxu0 %v3602_v32 }
 0x2d5   : > { %3221 = vmatpush3.msra.mxu0 %v2945_v7  ;;  %v3028_v7 = vld [vmem:[%s3675_s12 + $0x40] sm:$0xff]  }
 0x2d6   : > { %3222 = vmatprep.subr.mxu0 %v3602_v32 }
 0x2d7   : > { %3223 = vmatpush3.msra.mxu0 %v2944_v54  ;;  %v1551_v54 = vmul.f32 %v4012_v52, %v4012_v52 }
 0x2d8   : > { %3224 = vmatprep.subr.mxu0 %v3602_v32 }
 0x2d9   : > { %3225 = vmatpush3.msra.mxu0 %v2941_v58  ;;  %v4018_v58 = vunpack.c.l.bf16 %v3028_v7  ;;  %v1563_v55 = vsel %vm391_vm0, %v1551_v54, 0.0 }
 0x2da   : > { %3226 = vmatprep.subr.mxu0 %v3602_v32 }
 0x2db   : > { %3227 = vmatpush3.msra.mxu0 %v2940_v8  ;;  %v1549_v8 = vmul.f32 %v4018_v58, %v4018_v58 }
 0x2dc   : > { %3228 = vmatprep.subr.mxu0 %v3602_v32 }
 0x2dd   : > { %3229 = vmatpush3.msra.mxu0 %v2937_v27  ;;  %v1557_v27 = vsel %vm391_vm0, %v1549_v8, 0.0 }
 0x2de   : > { %3230 = vmatprep.subr.mxu0 %v3602_v32 }
 0x2df   : > { %3231 = vmatpush3.msra.mxu0 %v2936_v56 }
 0x2e0   : > { %3235 = vmatprep.subr.mxu0 %v3602_v32 }
 0x339   : > { %v745_v21 = vpop.trf.xlu1 }
 0x33a   : > { %3189 = vmatmul.mubr.msk.f32.vlgmr.msra.gmra.mxu1 %vm761_vm13, %v745_v21 }
 0x33b   : > { %3198 = vmatpush3.xpose.msk.msra.mxu1 %vm391_vm0, %v1018_v23  ;;  %3191 = vmatprep.mubr.msk.f32.mxu1 %vm3603_vm1, %v3602_v32 }
 0x33c   : > { %3199 = vmatprep.subr.mxu1 %v3602_v32 }
 0x33d   : > { %v746_v34 = vpop.trf.xlu1 }
 0x33e   : > { %3192 = vmatmul.mubr.msk.f32.gmra.mxu1 %vm761_vm13, %v746_v34 }
 0x33f   : > { %3200 = vmatpush3.xpose.msk.msra.mxu1 %vm391_vm0, %v1016_v33  ;;  %3194 = vmatprep.mubr.msk.f32.mxu1 %vm3603_vm1, %v3602_v32 }
 0x340   : > { %3201 = vmatprep.subr.mxu1 %v3602_v32 }
 0x341   : > { %v747_v3 = vpop.trf.xlu1 }
 0x342   : > { %3195 = vmatmul.mubr.msk.f32.gmra.mxu1 %vm761_vm13, %v747_v3 }
 0x343   : > { %3202 = vmatpush3.xpose.msk.msra.mxu1 %vm391_vm0, %v1014_v40  ;;  %3213 = vmatprep.mubr.msk.f32.mxu1 %vm3603_vm1, %v3602_v32 }
 0x344   : > { %3203 = vmatprep.subr.mxu1 %v3602_v32 }
 0x347   : > { %3204 = vmatpush3.xpose.msk.msra.mxu1 %vm391_vm0, %v1012_v44 }
 0x348   : > { %3205 = vmatprep.subr.mxu1 %v3602_v32 }
 0x34b   : > { %3206 = vmatpush3.xpose.msk.msra.mxu1 %vm391_vm0, %v1010_v53 }
 0x34c   : > { %3207 = vmatprep.subr.mxu1 %v3602_v32 }
 0x34f   : > { %3208 = vmatpush3.xpose.msk.msra.mxu1 %vm391_vm0, %v1008_v48  ;;  %v3031_v48 = vld [vmem:[%s3675_s12 + $0x58] sm:$0xff]  }
 0x350   : > { %3209 = vmatprep.subr.mxu1 %v3602_v32  ;;  %v4024_v56 = vunpack.c.l.bf16 %v3031_v48 }
 0x353   : > { %3210 = vmatpush3.xpose.msk.msra.mxu1 %vm391_vm0, %v1006_v46  ;;  %v3997_v46 = vunpack.c.h.bf16 %v3031_v48 }
 0x354   : > { %3211 = vmatprep.subr.mxu1 %v3602_v32 }
 0x355   : > { %v1556_v16 = vmul.f32 %v3997_v46, %v3997_v46 }
 0x357   : > { %3212 = vmatpush3.xpose.msk.msra.mxu1 %vm391_vm0, %v1004_v50  ;;  %v4005_v50 = vunpack.c.l.bf16 %v3030_v49 }
 0x358   : > { %3380 = vmatprep.subr.mxu1 %v3602_v32 }
 0x359   : > { %v1553_v4 = vmul.f32 %v4005_v50, %v4005_v50 }
 0x35a   : > { %3214 = vmatmul.mubr.msk.f32.vlgmr.msra.gmra.mxu1 %vm391_vm0, %v906_v47  ;;  %v1578_v47 = vsel %vm391_vm0, %v1556_v16, 0.0 }
 0x35b   : > { %3243 = vmatprep.mubr.msk.f32.mxu1 %vm3603_vm1, %v3602_v32  ;;  %1579 = vadd.xlane.f32.xlu1 %v1578_v47  ;;  %v1569_v6 = vsel %vm391_vm0, %v1553_v4, 0.0 }
 0x35f   : > { %1573 = vadd.xlane.f32.xlu1 %v1572_v51 }
 0x363   : > { %1570 = vadd.xlane.f32.xlu1 %v1569_v6 }
 0x367   : > { %1564 = vadd.xlane.f32.xlu1 %v1563_v55 }
 0x36b   : > { %1558 = vadd.xlane.f32.xlu1 %v1557_v27 }
 0x3fa   : > { %v3975_v57 = vpop.f32.mrf.mxu1 }
 0x3fc   : > { %v3190_v59 = vpop.f32.mrf.mxu1 }
 0x3fd   : > { %v1555_v59 = vmul.f32 %v4024_v56, %v4024_v56 }
 0x3fe   : > { %v3977_v60 = vpop.f32.mrf.mxu1 }
 0x400   : > { %v3193_v61 = vpop.f32.mrf.mxu1 }
 0x401   : > { %v4028_v61 = vunpack.c.h.bf16 %v3029_v17 }
 0x402   : > { %v3979_v62 = vpop.f32.mrf.mxu1 }
 0x404   : > { %v3196_v63 = vpop.f32.mrf.mxu1 }
 0x405   : > { %v1575_v63 = vsel %vm391_vm0, %v1555_v59, 0.0 }
 0x41a   : > { %v1112_v0 = vpop.f32.mrf.mxu1 }
 0x41b   : > { %v1116_v2 = vmul.f32 %v1112_v0, %v3829_v10  ;;  %v1552_v0 = vmul.f32 %v4028_v61, %v4028_v61 }
 0x41c   : > { %v3215_v9 = vpop.f32.mrf.mxu1 }
 0x41d   : > { %v1117_v11 = vadd.f32 %v1116_v2, %v3831_v12  ;;  %v4033_v2 = vunpack.c.h.bf16 %v3028_v7  ;;  %v4036_v9 = vld [vmem:[%s3709_s16 + $0x8] sm:$0xff]  }
 0x41f   : > { %v2802_v13 = vmul.f32 -1.442695, %v1117_v11  ;;  %v1566_v11 = vsel %vm391_vm0, %v1552_v0, 0.0 }
 0x421   : > { %3484 = vpow2.f32 %v2802_v13  ;;  %v1550_v13 = vmul.f32 %v4033_v2, %v4033_v2 }
 0x42e   : > { %v3485_v14 = vpop.eup %3484 }
 0x42f   : > { %v1121_v15 = vadd.f32 1.0, %v3485_v14  ;;  %v4042_v14 = vunpack.c.l.bf16 %v4036_v9 }
 0x431   : > { %3486 = vrcp.f32 %v1121_v15  ;;  %v1560_v15 = vsel %vm391_vm0, %v1550_v13, 0.0 }
 0x43e   : > { %v3487_v18 = vpop.eup %3486 }
 0x43f   : > { %v1124_v19 = vsel %vm626_vm6, %v3487_v18, -inf }
 0x440   : > { %v1125_v20 = vrot.slane %v1124_v19, 4 }
 0x442   : > { %v1126_v21 = vmax.f32 %v1124_v19, %v1125_v20 }
 0x444   : > { %v1127_v23 = vrot.slane %v1126_v21, 2 }
 0x446   : > { %v1128_v24 = vmax.f32 %v1126_v21, %v1127_v23 }
 0x448   : > { %v1129_v25 = vrot.slane %v1128_v24, 1 }
 0x44a   : > { %v1130_v26 = vmax.f32 %v1128_v24, %v1129_v25 }
 0x44c   : > { %vm1131_vm4 = vcmp.ge.f32.partialorder %v3487_v18, %v1130_v26 }
 0x44d   : > { %v1132_v28 = vsel %vm1131_vm4, %v3836_v31, 8 }
 0x44e   : > { %v1133_v29 = vsel %vm626_vm6, %v1132_v28, 2147483647 }
 0x44f   : > { %v1134_v1 = vrot.slane %v1133_v29, 4 }
 0x451   : > { %vm1135_vm5 = vcmp.lt.s32.totalorder %v1133_v29, %v1134_v1 }
 0x452   : > { %v1136_v30 = vsel %vm1135_vm5, %v1133_v29, %v1134_v1 }
 0x453   : > { %v1137_v33 = vrot.slane %v1136_v30, 2 }
 0x455   : > { %vm1138_vm7 = vcmp.lt.s32.totalorder %v1136_v30, %v1137_v33 }
 0x456   : > { %v1139_v34 = vsel %vm1138_vm7, %v1136_v30, %v1137_v33 }
 0x457   : > { %v1140_v35 = vrot.slane %v1139_v34, 1 }
 0x459   : > { %vm1141_vm8 = vcmp.lt.s32.totalorder %v1139_v34, %v1140_v35 }
 0x45a   : > { %v1142_v36 = vsel %vm1141_vm8, %v1139_v34, %v1140_v35 }
 0x45b   : > { %vm1143_vm9 = vcmp.eq.s32.totalorder %v3836_v31, %v1142_v36 }
 0x45c   : > { %v2803_v37 = vsel %vm1143_vm9, 1.0, %v3602_v32 }
 0x45d   : > { %v1146_v38 = vmul.f32 %v3487_v18, %v2803_v37  ;;  %v1535_v18 = vmul.f32 %v4042_v14, %v4042_v14 }
 0x45f   : > { %3233 = vmatmul.mubr.msk.f32.vlgmr.msra.gmra.mxu0 %vm626_vm6, %v1146_v38  ;;  %3381 = vmatpush3.msra.mxu1 %v1146_v38  ;;  %v1220_v39 = vsel %vm626_vm6, %v1146_v38, 0.0  ;;  %v1536_v19 = vsel %vm391_vm0, %v1535_v18, 0.0 }
 0x460   : > { %3236 = vmatpush3.msra.mxu0 %v1146_v38  ;;  %1221 = vadd.xlane.f32.xlu0 %v1220_v39 }
 0x461   : > { %3237 = vmatprep.mubr.msk.f32.mxu0 %vm3603_vm1, %v3602_v32  ;;  %3255 = vmatprep.subr.mxu0 %v3602_v32 }
 0x462   : > { %3246 = vmatprep.subr.mxu1 %v3602_v32 }
 0x4e9   : > { %v1222_v40 = vpop.xlane.xlu0 %1221 }
 0x4ea   : > { %v1223_v3 = vadd.f32 1.0, %v1222_v40 }
 0x4ec   : > { %3488 = vrcp.f32 %v1223_v3 }
 0x4f9   : > { %v3489_v41 = vpop.eup %3488 }
 0x51f   : > { %v1216_v43 = vpop.f32.mrf.mxu0 }
 0x520   : > { %v1217_v44 = vadd.f32 %v1216_v43, %v873_v42 }
 0x521   : > { %v3234_v53 = vpop.f32.mrf.mxu0 }
 0x522   : > { %v1225_v45 = vmul.f32 %v3489_v41, %v1217_v44 }
 0x524   : > { %1226 = vxpose.xlu0.b32.start.end [1/1] (short) (narrow) %v1225_v45, 24 }
 0x559   : > { %1576 = vadd.xlane.f32.xlu0 %v1575_v63 }
 0x55d   : > { %1567 = vadd.xlane.f32.xlu0 %v1566_v11 }
 0x561   : > { %1561 = vadd.xlane.f32.xlu0 %v1560_v15 }
 0x565   : > { %1537 = vadd.xlane.f32.xlu0 %v1536_v19 }
 0x5a0   : > { %v1242_v20 = vpop.trf.xlu0 }
 0x5a1   : > { %3238 = vmatmul.mubr.msk.f32.vlgmr.msra.gmra.mxu0 %vm761_vm13, %v1242_v20 }
 0x5a2   : > { %3256 = vmatpush3.msra.mxu0 %v3979_v62  ;;  %3240 = vmatprep.mubr.msk.f32.mxu0 %vm3603_vm1, %v3602_v32 }
 0x5a3   : > { %3257 = vmatprep.subr.mxu0 %v3602_v32 }
 0x5a4   : > { %3258 = vmatpush3.msra.mxu0 %v3977_v60  ;;  %v1243_v21 = vpop.trf.xlu0  ;;  %v389_v60 = vld [vmem:[%s4321_s4] sm:$0xff] }
 0x5a5   : > { %3259 = vmatprep.subr.mxu0 %v3602_v32  ;;  %3241 = vmatmul.mubr.msk.f32.gmra.mxu0 %vm761_vm13, %v1243_v21 }
 0x5a6   : > { %3260 = vmatpush3.msra.mxu0 %v3975_v57  ;;  %3261 = vmatprep.mubr.msk.f32.mxu0 %vm3603_vm1, %v3602_v32  ;;  %v1580_v57 = vpop.xlane.xlu1 %1579 }
 0x5a7   : > { %3283 = vmatprep.subr.mxu0 %v3602_v32  ;;  %3490 = vrsqrt.f32 %v1580_v57  ;;  %vm1632_vm10 = vcmp.eq.f32.partialorder %v1580_v57, inf  ;;  %v1635_v33 = vand.u32 2147483648, %v1580_v57  ;;  %vm1634_vm11 = vcmp.eq.f32.partialorder %v1580_v57, 0.0 }
 0x5a8   : > { %v1244_v62 = vpop.trf.xlu0 }
 0x5a9   : > { %3244 = vmatmul.mubr.msk.f32.vlgmr.msra.gmra.mxu1 %vm761_vm13, %v1244_v62  ;;  %3262 = vmatmul.mubr.msk.f32.vlgmr.msra.gmra.mxu0 %vm391_vm0, %v389_v60 }
 0x5aa   : > { %3252 = vmatprep.mubr.msk.f32.mxu1 %vm3603_vm1, %v3602_v32  ;;  %3299 = vmatprep.mubr.msk.f32.mxu0 %vm3603_vm1, %v3602_v32  ;;  %v1574_v24 = vpop.xlane.xlu1 %1573 }
 0x5ab   : > { %vm1618_vm15 = vcmp.eq.f32.partialorder %v1574_v24, inf  ;;  %v1621_v53 = vand.u32 2147483648, %v1574_v24  ;;  %vm1620_vm2 = vcmp.eq.f32.partialorder %v1574_v24, 0.0 }
 0x5ae   : > { %v1571_v25 = vpop.xlane.xlu1 %1570 }
 0x5af   : > { %vm1611_vm3 = vcmp.eq.f32.partialorder %v1571_v25, inf  ;;  %v1614_v17 = vand.u32 2147483648, %v1571_v25  ;;  %vm1613_vm4 = vcmp.eq.f32.partialorder %v1571_v25, 0.0 }
 0x5b2   : > { %v4069_v30 = vpop.xlane.xlu1 %1564 }
 0x5b3   : > { %vm1597_vm8 = vcmp.eq.f32.partialorder %v4069_v30, inf  ;;  %v1600_v18 = vand.u32 2147483648, %v4069_v30  ;;  %vm1599_vm9 = vcmp.eq.f32.partialorder %v4069_v30, 0.0 }
 0x5b4   : > { %v3491_v26 = vpop.eup %3490 }
 0x5b5   : > { %v1631_v29 = vmul.f32 %v3491_v26, %v1580_v57 }
 0x5b6   : > { %v4075_v43 = vpop.xlane.xlu1 %1558 }
 0x5b7   : > { %v1633_v34 = vsel %vm1632_vm10, %v1580_v57, %v1631_v29 }
 0x5b8   : > { %v1636_v38 = vsel %vm1634_vm11, %v1635_v33, %v1633_v34 }
 0x5b9   : > { %v1644_v44 = vmax.f32 %v1636_v38, 1e-12 }
 0x5e2   : > { %v1577_v23 = vpop.xlane.xlu0 %1576 }
 0x5e3   : > { %3492 = vrsqrt.f32 %v1577_v23  ;;  %vm1625_vm12 = vcmp.eq.f32.partialorder %v1577_v23, inf  ;;  %v1628_v39 = vand.u32 2147483648, %v1577_v23  ;;  %vm1627_vm14 = vcmp.eq.f32.partialorder %v1577_v23, 0.0 }
 0x5e4   : > { %3494 = vrsqrt.f32 %v1574_v24 }
 0x5e5   : > { %3496 = vrsqrt.f32 %v1571_v25 }
 0x5e6   : > { %v1568_v28 = vpop.xlane.xlu0 %1567 }
 0x5e7   : > { %3498 = vrsqrt.f32 %v1568_v28  ;;  %vm1604_vm5 = vcmp.eq.f32.partialorder %v1568_v28, inf  ;;  %v1607_v8 = vand.u32 2147483648, %v1568_v28  ;;  %vm1606_vm7 = vcmp.eq.f32.partialorder %v1568_v28, 0.0 }
 0x5e8   : > { %3500 = vrsqrt.f32 %v4069_v30 }
 0x5ea   : > { %v4072_v37 = vpop.xlane.xlu0 %1561 }
 0x5eb   : > { %3502 = vrsqrt.f32 %v4072_v37  ;;  %vm1590_vm10 = vcmp.eq.f32.partialorder %v4072_v37, inf  ;;  %vm1592_vm11 = vcmp.eq.f32.partialorder %v4072_v37, 0.0 }
 0x5ec   : > { %3504 = vrsqrt.f32 %v4075_v43 }
 0x5ed   : > { %3506 = vrcp.f32 %v1644_v44 }
 0x5ee   : > { %v4078_v49 = vpop.xlane.xlu0 %1537 }
 0x5ef   : > { %3508 = vrsqrt.f32 %v4078_v49 }
 0x5f0   : > { %v3493_v1 = vpop.eup %3492 }
 0x5f1   : > { %v1624_v35 = vmul.f32 %v3493_v1, %v1577_v23  ;;  %v3495_v36 = vpop.eup %3494 }
 0x5f2   : > { %v1617_v3 = vmul.f32 %v3495_v36, %v1574_v24  ;;  %v3497_v42 = vpop.eup %3496 }
 0x5f3   : > { %v1626_v40 = vsel %vm1625_vm12, %v1577_v23, %v1624_v35  ;;  %v1610_v48 = vmul.f32 %v3497_v42, %v1571_v25  ;;  %vm1583_vm12 = vcmp.eq.f32.partialorder %v4075_v43, inf }
 0x5f4   : > { %v1629_v41 = vsel %vm1627_vm14, %v1628_v39, %v1626_v40  ;;  %v1619_v45 = vsel %vm1618_vm15, %v1574_v24, %v1617_v3  ;;  %v3499_v16 = vpop.eup %3498  ;;  %vm1585_vm14 = vcmp.eq.f32.partialorder %v4075_v43, 0.0  ;;  %vm1541_vm15 = vcmp.eq.f32.partialorder %v4078_v49, inf }
 0x5f5   : > { %v1643_v22 = vmax.f32 %v1629_v41, 1e-12  ;;  %v1622_v47 = vsel %vm1620_vm2, %v1621_v53, %v1619_v45  ;;  %v1612_v51 = vsel %vm1611_vm3, %v1571_v25, %v1610_v48  ;;  %v1603_v4 = vmul.f32 %v3499_v16, %v1568_v28  ;;  %v3501_v7 = vpop.eup %3500 }
 0x5f6   : > { %v1642_v54 = vmax.f32 %v1622_v47, 1e-12  ;;  %v1615_v55 = vsel %vm1613_vm4, %v1614_v17, %v1612_v51  ;;  %v1596_v63 = vmul.f32 %v3501_v7, %v4069_v30  ;;  %v1593_v25 = vand.u32 2147483648, %v4072_v37 }
 0x5f7   : > { %3510 = vrcp.f32 %v1643_v22  ;;  %v1605_v59 = vsel %vm1604_vm5, %v1568_v28, %v1603_v4  ;;  %v1641_v13 = vmax.f32 %v1615_v55, 1e-12  ;;  %v1544_v40 = vand.u32 2147483648, %v4078_v49  ;;  %v3034_v55 = vld [vmem:[%s3809_s19 + $0x50] sm:$0xff]  }
 0x5f8   : > { %v3503_v0 = vpop.eup %3502  ;;  %3512 = vrcp.f32 %v1642_v54  ;;  %v1608_v15 = vsel %vm1606_vm7, %v1607_v8, %v1605_v59  ;;  %v1598_v20 = vsel %vm1597_vm8, %v4069_v30, %v1596_v63  ;;  %v2792_v30 = vld [vmem:[%s4321_s4 + $0x8] sm:$0xff]  ;;  %vm1543_vm2 = vcmp.eq.f32.partialorder %v4078_v49, 0.0  ;;  %v3039_v54 = vld [vmem:[%s3675_s12 + $0x78] sm:$0xff]  }
 0x5f9   : > { %v1589_v21 = vmul.f32 %v3503_v0, %v4072_v37  ;;  %v3505_v62 = vpop.eup %3504  ;;  %3514 = vrcp.f32 %v1641_v13  ;;  %v1640_v57 = vmax.f32 %v1608_v15, 1e-12  ;;  %v1601_v24 = vsel %vm1599_vm9, %v1600_v18, %v1598_v20  ;;  %v3037_v59 = vld [vmem:[%s3675_s12 + $0x68] sm:$0xff]  }
 0x5fa   : > { %v3507_v23 = vpop.eup %3506  ;;  %v1582_v1 = vmul.f32 %v3505_v62, %v4075_v43  ;;  %v1639_v33 = vmax.f32 %v1601_v24, 1e-12  ;;  %v4143_v8 = vunpack.c.l.bf16 %v3039_v54  ;;  %v4149_v0 = vunpack.c.h.bf16 %v3039_v54 }
 0x5fb   : > { %v1591_v29 = vsel %vm1590_vm10, %v4072_v37, %v1589_v21  ;;  %3516 = vrcp.f32 %v1640_v57  ;;  %v1660_v34 = vmul.f32 %v3507_v23, %v3997_v46  ;;  %v1586_v37 = vand.u32 2147483648, %v4075_v43  ;;  %v3036_v21 = vld [vmem:[%s3675_s12 + $0x60] sm:$0xff]  }
 0x5fc   : > { %v3509_v28 = vpop.eup %3508  ;;  %v1594_v36 = vsel %vm1592_vm11, %v1593_v25, %v1591_v29  ;;  %v1584_v39 = vsel %vm1583_vm12, %v4075_v43, %v1582_v1  ;;  %3518 = vrcp.f32 %v1639_v33  ;;  %v2977_v13 = vunpack.c.h.bf16 %v3034_v55 }
 0x5fd   : > { %v1540_v38 = vmul.f32 %v3509_v28, %v4078_v49  ;;  %v1638_v46 = vmax.f32 %v1594_v36, 1e-12  ;;  %v1587_v44 = vsel %vm1585_vm14, %v1586_v37, %v1584_v39  ;;  %v4153_v15 = vunpack.c.l.bf16 %v3037_v59  ;;  %v3032_v28 = vld [vmem:[%s3809_s19 + $0x40] sm:$0xff]  }
 0x5fe   : > { %v1637_v43 = vmax.f32 %v1587_v44, 1e-12  ;;  %v2126_v20 = vmul.f32 %v4149_v0, %v4149_v0  ;;  %v4186_v39 = vunpack.c.h.bf16 %v3037_v59 }
 0x5ff   : > { %v1542_v41 = vsel %vm1541_vm15, %v4078_v49, %v1540_v38  ;;  %3520 = vrcp.f32 %v1638_v46  ;;  %v2121_v25 = vmul.f32 %v4153_v15, %v4153_v15  ;;  %v4188_v46 = vunpack.c.h.bf16 %v3036_v21 }
 0x600   : > { %v1545_v53 = vsel %vm1543_vm2, %v1544_v40, %v1542_v41  ;;  %3522 = vrcp.f32 %v1637_v43  ;;  %v2148_v57 = vsel %vm391_vm0, %v2126_v20, 0.0  ;;  %v2122_v40 = vmul.f32 %v4186_v39, %v4186_v39 }
 0x601   : > { %v1546_v16 = vmax.f32 %v1545_v53, 1e-12  ;;  %2149 = vadd.xlane.f32.xlu1 %v2148_v57  ;;  %v2133_v1 = vsel %vm391_vm0, %v2121_v25, 0.0 }
 0x602   : > { %v2136_v44 = vsel %vm391_vm0, %v2122_v40, 0.0 }
 0x603   : > { %3524 = vrcp.f32 %v1546_v16 }
 0x604   : > { %v3511_v35 = vpop.eup %3510 }
 0x605   : > { %v1658_v3 = vmul.f32 %v3511_v35, %v4024_v56  ;;  %v3513_v42 = vpop.eup %3512 }
 0x606   : > { %v1656_v45 = vmul.f32 %v3513_v42, %v3999_v5  ;;  %v3515_v48 = vpop.eup %3514  ;;  %v4195_v42 = vunpack.c.h.bf16 %v4036_v9 }
 0x607   : > { %v1654_v56 = vmul.f32 %v3515_v48, %v4005_v50 }
 0x608   : > { %v3517_v22 = vpop.eup %3516  ;;  %v2105_v43 = vmul.f32 %v4195_v42, %v4195_v42 }
 0x609   : > { %v1652_v49 = vmul.f32 %v3517_v22, %v4028_v61  ;;  %v3519_v47 = vpop.eup %3518 }
 0x60a   : > { %v1650_v5 = vmul.f32 %v3519_v47, %v4012_v52  ;;  %v2106_v53 = vsel %vm391_vm0, %v2105_v43, 0.0 }
 0x60c   : > { %v3521_v17 = vpop.eup %3520 }
 0x60d   : > { %v1648_v50 = vmul.f32 %v3521_v17, %v4033_v2  ;;  %v3523_v51 = vpop.eup %3522 }
 0x60e   : > { %v1646_v52 = vmul.f32 %v3523_v51, %v4018_v58 }
 0x610   : > { %v3525_v61 = vpop.eup %3524 }
 0x611   : > { %v1548_v4 = vmul.f32 %v3525_v61, %v4042_v14  ;;  %v3038_v14 = vld [vmem:[%s3675_s12 + $0x70] sm:$0xff]  }
 0x612   : > { %v4147_v63 = vunpack.c.l.bf16 %v3038_v14  ;;  %v4181_v36 = vunpack.c.h.bf16 %v3038_v14 }
 0x614   : > { %v2123_v18 = vmul.f32 %v4147_v63, %v4147_v63  ;;  %v2124_v37 = vmul.f32 %v4181_v36, %v4181_v36 }
 0x616   : > { %v2139_v23 = vsel %vm391_vm0, %v2123_v18, 0.0  ;;  %v2142_v38 = vsel %vm391_vm0, %v2124_v37, 0.0 }
 0x617   : > { %2143 = vadd.xlane.f32.xlu1 %v2142_v38 }
 0x61b   : > { %2137 = vadd.xlane.f32.xlu1 %v2136_v44 }
 0x661   : > { %v1333_v6 = vpop.f32.mrf.mxu0 }
 0x663   : > { %v3239_v27 = vpop.f32.mrf.mxu0 }
 0x665   : > { %v1338_v11 = vpop.f32.mrf.mxu0 }
 0x667   : > { %v3242_v19 = vpop.f32.mrf.mxu0 }
 0x668   : > { %v3033_v19 = vld [vmem:[%s3809_s19 + $0x48] sm:$0xff]  }
 0x669   : > { %v1343_v60 = vpop.f32.mrf.mxu1  ;;  %v4138_v2 = vpop.f32.mrf.mxu0  ;;  %v2973_v24 = vunpack.c.h.bf16 %v3033_v19  ;;  %v2972_v29 = vunpack.c.l.bf16 %v3033_v19 }
 0x66a   : > { %3247 = vmatpush3.msra.mxu1 %v1343_v60  ;;  %v2976_v60 = vunpack.c.l.bf16 %v3034_v55 }
 0x66b   : > { %v3245_v26 = vpop.f32.mrf.mxu1  ;;  %3248 = vmatprep.subr.mxu1 %v3602_v32  ;;  %v3263_v7 = vpop.f32.mrf.mxu0 }
 0x66c   : > { %3249 = vmatpush3.msra.mxu1 %v1338_v11  ;;  %v2125_v11 = vmul.f32 %v4143_v8, %v4143_v8  ;;  %v4168_v26 = vunpack.c.l.bf16 %v3036_v21 }
 0x66d   : > { %3250 = vmatprep.subr.mxu1 %v3602_v32 }
 0x66e   : > { %3251 = vmatpush3.msra.mxu1 %v1333_v6  ;;  %v3035_v6 = vld [vmem:[%s3809_s19 + $0x58] sm:$0xff]   ;;  %v2145_v62 = vsel %vm391_vm0, %v2125_v11, 0.0  ;;  %v2119_v33 = vmul.f32 %v4168_v26, %v4168_v26 }
 0x66f   : > { %3253 = vmatmul.mubr.msk.f32.vlgmr.msra.gmra.mxu1 %vm391_vm0, %v2792_v30  ;;  %3264 = vmatprep.subr.mxu1 %v3602_v32  ;;  %v2981_v58 = vunpack.c.h.bf16 %v3035_v6  ;;  %v2980_v27 = vunpack.c.l.bf16 %v3035_v6  ;;  %v2969_v30 = vunpack.c.h.bf16 %v3032_v28 }
 0x670   : > { %3265 = vmatpush3.xpose.msk.msra.mxu1 %vm391_vm0, %v1660_v34  ;;  %3280 = vmatprep.mubr.msk.f32.mxu1 %vm3603_vm1, %v3602_v32  ;;  %v2968_v34 = vunpack.c.l.bf16 %v3032_v28  ;;  %v2127_v35 = vsel %vm391_vm0, %v2119_v33, 0.0 }
 0x671   : > { %3266 = vmatprep.subr.mxu1 %v3602_v32  ;;  %3284 = vmatpush3.msra.mxu0 %v2981_v58 }
 0x672   : > { %3285 = vmatprep.subr.mxu0 %v3602_v32  ;;  %2146 = vadd.xlane.f32.xlu0 %v2145_v62 }
 0x673   : > { %3286 = vmatpush3.msra.mxu0 %v2980_v27 }
 0x674   : > { %3267 = vmatpush3.xpose.msk.msra.mxu1 %vm391_vm0, %v1658_v3  ;;  %3287 = vmatprep.subr.mxu0 %v3602_v32  ;;  %v2120_v3 = vmul.f32 %v4188_v46, %v4188_v46 }
 0x675   : > { %3268 = vmatprep.subr.mxu1 %v3602_v32  ;;  %3288 = vmatpush3.msra.mxu0 %v2977_v13 }
 0x676   : > { %3289 = vmatprep.subr.mxu0 %v3602_v32  ;;  %2140 = vadd.xlane.f32.xlu0 %v2139_v23  ;;  %v2130_v41 = vsel %vm391_vm0, %v2120_v3, 0.0 }
 0x677   : > { %3290 = vmatpush3.msra.mxu0 %v2976_v60  ;;  %2131 = vadd.xlane.f32.xlu1 %v2130_v41 }
 0x678   : > { %3269 = vmatpush3.xpose.msk.msra.mxu1 %vm391_vm0, %v1656_v45  ;;  %3291 = vmatprep.subr.mxu0 %v3602_v32 }
 0x679   : > { %3270 = vmatprep.subr.mxu1 %v3602_v32  ;;  %3292 = vmatpush3.msra.mxu0 %v2973_v24 }
 0x67a   : > { %3293 = vmatprep.subr.mxu0 %v3602_v32  ;;  %2134 = vadd.xlane.f32.xlu0 %v2133_v1 }
 0x67b   : > { %3294 = vmatpush3.msra.mxu0 %v2972_v29  ;;  %2107 = vadd.xlane.f32.xlu1 %v2106_v53 }
 0x67c   : > { %3271 = vmatpush3.xpose.msk.msra.mxu1 %vm391_vm0, %v1654_v56  ;;  %3295 = vmatprep.subr.mxu0 %v3602_v32 }
 0x67d   : > { %3272 = vmatprep.subr.mxu1 %v3602_v32  ;;  %3296 = vmatpush3.msra.mxu0 %v2969_v30 }
 0x67e   : > { %3297 = vmatprep.subr.mxu0 %v3602_v32  ;;  %2128 = vadd.xlane.f32.xlu0 %v2127_v35 }
 0x67f   : > { %3298 = vmatpush3.msra.mxu0 %v2968_v34 }
 0x680   : > { %3273 = vmatpush3.xpose.msk.msra.mxu1 %vm391_vm0, %v1652_v49  ;;  %3302 = vmatprep.subr.mxu0 %v3602_v32 }
 0x681   : > { %3274 = vmatprep.subr.mxu1 %v3602_v32 }
 0x684   : > { %3275 = vmatpush3.xpose.msk.msra.mxu1 %vm391_vm0, %v1650_v5 }
 0x685   : > { %3276 = vmatprep.subr.mxu1 %v3602_v32 }
 0x688   : > { %3277 = vmatpush3.xpose.msk.msra.mxu1 %vm391_vm0, %v1648_v50 }
 0x689   : > { %3278 = vmatprep.subr.mxu1 %v3602_v32 }
 0x68c   : > { %3279 = vmatpush3.xpose.msk.msra.mxu1 %vm391_vm0, %v1646_v52  ;;  %v2150_v52 = vpop.xlane.xlu1 %2149 }
 0x68d   : > { %3322 = vmatprep.subr.mxu1 %v3602_v32  ;;  %vm2202_vm4 = vcmp.eq.f32.partialorder %v2150_v52, inf  ;;  %v2205_v19 = vand.u32 2147483648, %v2150_v52  ;;  %vm2204_vm8 = vcmp.eq.f32.partialorder %v2150_v52, 0.0 }
 0x68f   : > { %3281 = vmatmul.mubr.msk.f32.vlgmr.msra.gmra.mxu1 %vm391_vm0, %v1548_v4 }
 0x690   : > { %3338 = vmatprep.mubr.msk.f32.mxu1 %vm3603_vm1, %v3602_v32 }
 0x6a0   : > { %v2144_v3 = vpop.xlane.xlu1 %2143 }
 0x6a1   : > { %vm2188_vm2 = vcmp.eq.f32.partialorder %v2144_v3, inf }
 0x6a4   : > { %v2138_v53 = vpop.xlane.xlu1 %2137 }
 0x6fb   : > { %v2147_v61 = vpop.xlane.xlu0 %2146 }
 0x6fc   : > { %vm2195_vm7 = vcmp.eq.f32.partialorder %v2147_v61, inf  ;;  %v2198_v60 = vand.u32 2147483648, %v2147_v61  ;;  %vm2197_vm9 = vcmp.eq.f32.partialorder %v2147_v61, 0.0 }
 0x6ff   : > { %v2141_v37 = vpop.xlane.xlu0 %2140 }
 0x700   : > { %vm2181_vm14 = vcmp.eq.f32.partialorder %v2141_v37, inf  ;;  %vm2183_vm15 = vcmp.eq.f32.partialorder %v2141_v37, 0.0 }
 0x703   : > { %v2135_v38 = vpop.xlane.xlu0 %2134 }
 0x72f   : > { %v4202_v45 = vpop.f32.mrf.mxu1 }
 0x731   : > { %v3254_v48 = vpop.f32.mrf.mxu1 }
 0x74f   : > { %v1754_v16 = vpop.f32.mrf.mxu1 }
 0x750   : > { %v1758_v56 = vmul.f32 %v1754_v16, %v3829_v10 }
 0x751   : > { %v3282_v9 = vpop.f32.mrf.mxu1 }
 0x752   : > { %v1759_v22 = vadd.f32 %v1758_v56, %v3831_v12  ;;  %v2129_v56 = vpop.xlane.xlu0 %2128  ;;  %v2132_v9 = vpop.xlane.xlu1 %2131 }
 0x754   : > { %v2838_v49 = vmul.f32 -1.442695, %v1759_v22  ;;  %v2184_v22 = vand.u32 2147483648, %v2141_v37 }
 0x756   : > { %3526 = vpow2.f32 %v2838_v49 }
 0x763   : > { %v3527_v47 = vpop.eup %3526 }
 0x764   : > { %v1763_v5 = vadd.f32 1.0, %v3527_v47 }
 0x766   : > { %3528 = vrcp.f32 %v1763_v5 }
 0x767   : > { %3530 = vrsqrt.f32 %v2147_v61 }
 0x768   : > { %3532 = vrsqrt.f32 %v2150_v52 }
 0x773   : > { %v3529_v17 = vpop.eup %3528 }
 0x774   : > { %v1766_v50 = vsel %vm626_vm6, %v3529_v17, -inf  ;;  %v3531_v27 = vpop.eup %3530 }
 0x775   : > { %v1767_v51 = vrot.slane %v1766_v50, 4  ;;  %v3533_v59 = vpop.eup %3532  ;;  %v2194_v13 = vmul.f32 %v3531_v27, %v2147_v61 }
 0x776   : > { %v2201_v18 = vmul.f32 %v3533_v59, %v2150_v52 }
 0x777   : > { %v1768_v4 = vmax.f32 %v1766_v50, %v1767_v51  ;;  %v2196_v57 = vsel %vm2195_vm7, %v2147_v61, %v2194_v13  ;;  %vm2174_vm7 = vcmp.eq.f32.partialorder %v2138_v53, inf }
 0x778   : > { %v2203_v21 = vsel %vm2202_vm4, %v2150_v52, %v2201_v18  ;;  %v2199_v28 = vsel %vm2197_vm9, %v2198_v60, %v2196_v57  ;;  %vm2167_vm4 = vcmp.eq.f32.partialorder %v2135_v38, inf  ;;  %vm2160_vm9 = vcmp.eq.f32.partialorder %v2132_v9, inf }
 0x779   : > { %v1769_v7 = vrot.slane %v1768_v4, 2  ;;  %v2206_v23 = vsel %vm2204_vm8, %v2205_v19, %v2203_v21  ;;  %v2213_v30 = vmax.f32 %v2199_v28, 1e-12  ;;  %vm2176_vm8 = vcmp.eq.f32.partialorder %v2138_v53, 0.0 }
 0x77a   : > { %v2214_v29 = vmax.f32 %v2206_v23, 1e-12  ;;  %v2163_v18 = vand.u32 2147483648, %v2132_v9  ;;  %v2156_v23 = vand.u32 2147483648, %v2129_v56 }
 0x77b   : > { %v1770_v6 = vmax.f32 %v1768_v4, %v1769_v7  ;;  %v2170_v4 = vand.u32 2147483648, %v2135_v38 }
 0x77c   : > { %3534 = vrcp.f32 %v2214_v29 }
 0x77d   : > { %v1771_v54 = vrot.slane %v1770_v6, 1  ;;  %3536 = vrcp.f32 %v2213_v30 }
 0x77e   : > { %3538 = vrsqrt.f32 %v2141_v37 }
 0x77f   : > { %v1772_v55 = vmax.f32 %v1770_v6, %v1771_v54  ;;  %3540 = vrsqrt.f32 %v2135_v38  ;;  %v2177_v6 = vand.u32 2147483648, %v2138_v53 }
 0x780   : > { %3542 = vrsqrt.f32 %v2144_v3 }
 0x781   : > { %vm1773_vm3 = vcmp.ge.f32.partialorder %v3529_v17, %v1772_v55  ;;  %3544 = vrsqrt.f32 %v2138_v53 }
 0x782   : > { %v1774_v58 = vsel %vm1773_vm3, %v3836_v31, 8  ;;  %3546 = vrsqrt.f32 %v2129_v56  ;;  %vm2190_vm3 = vcmp.eq.f32.partialorder %v2144_v3, 0.0 }
 0x783   : > { %v1775_v14 = vsel %vm626_vm6, %v1774_v58, 2147483647  ;;  %3548 = vrsqrt.f32 %v2132_v9 }
 0x784   : > { %v1776_v11 = vrot.slane %v1775_v14, 4 }
 0x786   : > { %vm1777_vm5 = vcmp.lt.s32.totalorder %v1775_v14, %v1776_v11 }
 0x787   : > { %v1778_v20 = vsel %vm1777_vm5, %v1775_v14, %v1776_v11  ;;  %vm2169_vm5 = vcmp.eq.f32.partialorder %v2135_v38, 0.0 }
 0x788   : > { %v1779_v62 = vrot.slane %v1778_v20, 2 }
 0x789   : > { %v3535_v40 = vpop.eup %3534 }
 0x78a   : > { %vm1780_vm10 = vcmp.lt.s32.totalorder %v1778_v20, %v1779_v62  ;;  %v3537_v44 = vpop.eup %3536  ;;  %v2230_v41 = vmul.f32 %v3535_v40, %v4149_v0 }
 0x78b   : > { %v1781_v24 = vsel %vm1780_vm10, %v1778_v20, %v1779_v62  ;;  %v3539_v43 = vpop.eup %3538  ;;  %v2228_v48 = vmul.f32 %v3537_v44, %v4143_v8  ;;  %v2191_v8 = vand.u32 2147483648, %v2144_v3  ;;  %vm2162_vm10 = vcmp.eq.f32.partialorder %v2132_v9, 0.0  ;;  %v2108_v44 = vpop.xlane.xlu1 %2107 }
 0x78c   : > { %v1782_v25 = vrot.slane %v1781_v24, 1  ;;  %3323 = vmatpush3.xpose.msk.msra.mxu1 %vm391_vm0, %v2230_v41  ;;  %v2180_v16 = vmul.f32 %v3539_v43, %v2141_v37  ;;  %v3541_v49 = vpop.eup %3540  ;;  %v2114_v41 = vand.u32 2147483648, %v2108_v44 }
 0x78d   : > { %3324 = vmatprep.subr.mxu1 %v3602_v32  ;;  %v3543_v5 = vpop.eup %3542 }
 0x78e   : > { %vm1783_vm11 = vcmp.lt.s32.totalorder %v1781_v24, %v1782_v25  ;;  %v2182_v0 = vsel %vm2181_vm14, %v2141_v37, %v2180_v16  ;;  %v2187_v50 = vmul.f32 %v3543_v5, %v2144_v3  ;;  %v3545_v52 = vpop.eup %3544  ;;  %vm2111_vm14 = vcmp.eq.f32.partialorder %v2108_v44, inf }
 0x78f   : > { %v1784_v1 = vsel %vm1783_vm11, %v1781_v24, %v1782_v25  ;;  %v2185_v47 = vsel %vm2183_vm15, %v2184_v22, %v2182_v0  ;;  %v2173_v58 = vmul.f32 %v3545_v52, %v2138_v53  ;;  %v3547_v27 = vpop.eup %3546  ;;  %vm2153_vm11 = vcmp.eq.f32.partialorder %v2129_v56, inf  ;;  %v4243_v22 = vld [vmem:[%s3896_s26 + $0x8] sm:$0xff]  }
 0x790   : > { %vm1785_vm12 = vcmp.eq.s32.totalorder %v3836_v31, %v1784_v1  ;;  %3325 = vmatpush3.xpose.msk.msra.mxu1 %vm391_vm0, %v2228_v48  ;;  %v2211_v51 = vmax.f32 %v2185_v47, 1e-12  ;;  %v2189_v61 = vsel %vm2188_vm2, %v2144_v3, %v2187_v50  ;;  %v3549_v59 = vpop.eup %3548  ;;  %v2152_v62 = vmul.f32 %v3547_v27, %v2129_v56 }
 0x791   : > { %v2839_v33 = vsel %vm1785_vm12, 1.0, %v3602_v32  ;;  %3326 = vmatprep.subr.mxu1 %v3602_v32  ;;  %v2192_v7 = vsel %vm2190_vm3, %v2191_v8, %v2189_v61  ;;  %v2175_v14 = vsel %vm2174_vm7, %v2138_v53, %v2173_v58  ;;  %v2159_v20 = vmul.f32 %v3549_v59, %v2132_v9 }
 0x792   : > { %v1788_v34 = vmul.f32 %v3529_v17, %v2839_v33  ;;  %v2166_v17 = vmul.f32 %v3541_v49, %v2135_v38  ;;  %v2212_v55 = vmax.f32 %v2192_v7, 1e-12  ;;  %3550 = vrcp.f32 %v2211_v51 }
 0x793   : > { %v2178_v13 = vsel %vm2176_vm8, %v2177_v6, %v2175_v14  ;;  %v2161_v60 = vsel %vm2160_vm9, %v2132_v9, %v2159_v20  ;;  %v2154_v24 = vsel %vm2153_vm11, %v2129_v56, %v2152_v62  ;;  %vm2155_vm12 = vcmp.eq.f32.partialorder %v2129_v56, 0.0 }
 0x794   : > { %3300 = vmatmul.mubr.msk.f32.vlgmr.msra.gmra.mxu0 %vm626_vm6, %v1788_v34  ;;  %v1862_v35 = vsel %vm626_vm6, %v1788_v34, 0.0  ;;  %v2168_v54 = vsel %vm2167_vm4, %v2135_v38, %v2166_v17  ;;  %3552 = vrcp.f32 %v2212_v55  ;;  %v2210_v19 = vmax.f32 %v2178_v13, 1e-12 }
 0x795   : > { %3303 = vmatpush3.msra.mxu0 %v1788_v34  ;;  %1863 = vadd.xlane.f32.xlu0 %v1862_v35  ;;  %v2171_v11 = vsel %vm2169_vm5, %v2170_v4, %v2168_v54  ;;  %v2164_v57 = vsel %vm2162_vm10, %v2163_v18, %v2161_v60  ;;  %v2157_v28 = vsel %vm2155_vm12, %v2156_v23, %v2154_v24  ;;  %vm2113_vm15 = vcmp.eq.f32.partialorder %v2108_v44, 0.0 }
 0x796   : > { %3304 = vmatprep.mubr.msk.f32.mxu0 %vm3603_vm1, %v3602_v32  ;;  %3313 = vmatprep.subr.mxu0 %v3602_v32  ;;  %v2209_v21 = vmax.f32 %v2171_v11, 1e-12  ;;  %3554 = vrcp.f32 %v2210_v19  ;;  %v2208_v25 = vmax.f32 %v2164_v57, 1e-12  ;;  %v2207_v30 = vmax.f32 %v2157_v28, 1e-12 }
 0x797   : > { %v1515_v0 = vunpack.c.l.bf16 %v4243_v22 }
 0x798   : > { %3556 = vrcp.f32 %v2209_v21 }
 0x799   : > { %3558 = vrcp.f32 %v2208_v25 }
 0x79a   : > { %3560 = vrcp.f32 %v2207_v30 }
 0x79b   : > { %3562 = vrsqrt.f32 %v2108_v44 }
 0x79f   : > { %v3551_v29 = vpop.eup %3550 }
 0x7a0   : > { %v2224_v34 = vmul.f32 %v3551_v29, %v4147_v63 }
 0x7a1   : > { %v3553_v1 = vpop.eup %3552 }
 0x7a2   : > { %v2226_v33 = vmul.f32 %v3553_v1, %v4181_v36 }
 0x7a3   : > { %v3555_v35 = vpop.eup %3554 }
 0x7a4   : > { %3327 = vmatpush3.xpose.msk.msra.mxu1 %vm391_vm0, %v2226_v33  ;;  %v2222_v37 = vmul.f32 %v3555_v35, %v4186_v39  ;;  %v3043_v35 = vld [vmem:[%s3809_s19 + $0x78] sm:$0xff]  }
 0x7a5   : > { %3328 = vmatprep.subr.mxu1 %v3602_v32  ;;  %v3557_v38 = vpop.eup %3556 }
 0x7a6   : > { %v2220_v40 = vmul.f32 %v3557_v38, %v4153_v15  ;;  %v3559_v36 = vpop.eup %3558  ;;  %v3013_v38 = vunpack.c.h.bf16 %v3043_v35 }
 0x7a7   : > { %v2218_v63 = vmul.f32 %v3559_v36, %v4188_v46  ;;  %v3561_v3 = vpop.eup %3560  ;;  %v3012_v36 = vunpack.c.l.bf16 %v3043_v35 }
 0x7a8   : > { %3329 = vmatpush3.xpose.msk.msra.mxu1 %vm391_vm0, %v2224_v34  ;;  %v2216_v39 = vmul.f32 %v3561_v3, %v4168_v26  ;;  %v3563_v15 = vpop.eup %3562  ;;  %v3041_v3 = vld [vmem:[%s3809_s19 + $0x68] sm:$0xff]  }
 0x7a9   : > { %3330 = vmatprep.subr.mxu1 %v3602_v32  ;;  %v2110_v43 = vmul.f32 %v3563_v15, %v2108_v44  ;;  %v3040_v15 = vld [vmem:[%s3809_s19 + $0x60] sm:$0xff]  }
 0x7ab   : > { %v2112_v46 = vsel %vm2111_vm14, %v2108_v44, %v2110_v43  ;;  %v3005_v44 = vunpack.c.h.bf16 %v3041_v3  ;;  %v3001_v43 = vunpack.c.h.bf16 %v3040_v15 }
 0x7ac   : > { %3331 = vmatpush3.xpose.msk.msra.mxu1 %vm391_vm0, %v2222_v37  ;;  %v2115_v53 = vsel %vm2113_vm15, %v2114_v41, %v2112_v46  ;;  %v3004_v41 = vunpack.c.l.bf16 %v3041_v3  ;;  %v3000_v46 = vunpack.c.l.bf16 %v3040_v15 }
 0x7ad   : > { %3332 = vmatprep.subr.mxu1 %v3602_v32  ;;  %v2116_v48 = vmax.f32 %v2115_v53, 1e-12 }
 0x7af   : > { %3564 = vrcp.f32 %v2116_v48  ;;  %v1490_v48 = vadd.f32 %v4138_v2, %v4202_v45 }
 0x7b0   : > { %3333 = vmatpush3.xpose.msk.msra.mxu1 %vm391_vm0, %v2220_v40  ;;  %v3042_v40 = vld [vmem:[%s3809_s19 + $0x70] sm:$0xff]  }
 0x7b1   : > { %3334 = vmatprep.subr.mxu1 %v3602_v32 }
 0x7b4   : > { %3335 = vmatpush3.xpose.msk.msra.mxu1 %vm391_vm0, %v2218_v63  ;;  %v3009_v63 = vunpack.c.h.bf16 %v3042_v40 }
 0x7b5   : > { %3336 = vmatprep.subr.mxu1 %v3602_v32 }
 0x7b8   : > { %3337 = vmatpush3.xpose.msk.msra.mxu1 %vm391_vm0, %v2216_v39  ;;  %v3008_v39 = vunpack.c.l.bf16 %v3042_v40 }
 0x7bc   : > { %v3565_v16 = vpop.eup %3564 }
 0x7bd   : > { %v2118_v56 = vmul.f32 %v3565_v16, %v4195_v42 }
 0x7bf   : > { %3339 = vmatmul.mubr.msk.f32.vlgmr.msra.gmra.mxu1 %vm391_vm0, %v2118_v56 }
 0x81e   : > { %v1864_v26 = vpop.xlane.xlu0 %1863 }
 0x81f   : > { %v1865_v9 = vadd.f32 1.0, %v1864_v26 }
 0x821   : > { %3566 = vrcp.f32 %v1865_v9 }
 0x82e   : > { %v3567_v5 = vpop.eup %3566 }
 0x854   : > { %v1858_v49 = vpop.f32.mrf.mxu0 }
 0x855   : > { %v1859_v47 = vadd.f32 %v1858_v49, %v1515_v0  ;;  %v2085_v0 = vunpack.c.h.bf16 %v4243_v22  ;;  %v2633_v22 = vld [vmem:[%s4322_s5] sm:$0xff] }
 0x856   : > { %v3301_v8 = vpop.f32.mrf.mxu0 }
 0x857   : > { %v1867_v17 = vmul.f32 %v3567_v5, %v1859_v47 }
 0x859   : > { %1868 = vxpose.xlu1.b32.start.end [1/1] (short) (narrow) %v1867_v17, 24 }
 0x87f   : > { %v2324_v50 = vpop.f32.mrf.mxu1 }
 0x880   : > { %v2328_v51 = vmul.f32 %v2324_v50, %v3829_v10 }
 0x881   : > { %v3340_v61 = vpop.f32.mrf.mxu1 }
 0x882   : > { %v2329_v42 = vadd.f32 %v2328_v51, %v3831_v12  ;;  %v3604_v51 = vmov 0  }
 0x883   : > { %3404 = vset.pattern.permute.xlu1 %v3604_v51 }
 0x884   : > { %v2873_v52 = vmul.f32 -1.442695, %v2329_v42  ;;  %2636 = vperm.xlu1 %3404, %v2633_v22  }
 0x886   : > { %3568 = vpow2.f32 %v2873_v52 }
 0x893   : > { %v3569_v4 = vpop.eup %3568 }
 0x894   : > { %v2333_v7 = vadd.f32 1.0, %v3569_v4 }
 0x896   : > { %3570 = vrcp.f32 %v2333_v7 }
 0x8a3   : > { %v3571_v12 = vpop.eup %3570 }
 0x8a4   : > { %v2336_v55 = vsel %vm626_vm6, %v3571_v12, -inf }
 0x8a5   : > { %v2337_v58 = vrot.slane %v2336_v55, 4 }
 0x8a7   : > { %v2338_v27 = vmax.f32 %v2336_v55, %v2337_v58 }
 0x8a9   : > { %v2339_v14 = vrot.slane %v2338_v27, 2 }
 0x8ab   : > { %v2340_v59 = vmax.f32 %v2338_v27, %v2339_v14 }
 0x8ad   : > { %v2341_v11 = vrot.slane %v2340_v59, 1 }
 0x8af   : > { %v2342_v13 = vmax.f32 %v2340_v59, %v2341_v11 }
 0x8b1   : > { %vm2343_vm2 = vcmp.ge.f32.partialorder %v3571_v12, %v2342_v13 }
 0x8b2   : > { %v2344_v18 = vsel %vm2343_vm2, %v3836_v31, 8 }
 0x8b3   : > { %v2345_v19 = vsel %vm626_vm6, %v2344_v18, 2147483647 }
 0x8b4   : > { %v2346_v20 = vrot.slane %v2345_v19, 4 }
 0x8b6   : > { %vm2347_vm3 = vcmp.lt.s32.totalorder %v2345_v19, %v2346_v20 }
 0x8b7   : > { %v2348_v21 = vsel %vm2347_vm3, %v2345_v19, %v2346_v20 }
 0x8b8   : > { %v2349_v62 = vrot.slane %v2348_v21, 2 }
 0x8ba   : > { %vm2350_vm4 = vcmp.lt.s32.totalorder %v2348_v21, %v2349_v62 }
 0x8bb   : > { %v2351_v60 = vsel %vm2350_vm4, %v2348_v21, %v2349_v62 }
 0x8bc   : > { %v2352_v57 = vrot.slane %v2351_v60, 1 }
 0x8be   : > { %vm2353_vm5 = vcmp.lt.s32.totalorder %v2351_v60, %v2352_v57 }
 0x8bf   : > { %v2354_v23 = vsel %vm2353_vm5, %v2351_v60, %v2352_v57 }
 0x8c0   : > { %vm2355_vm7 = vcmp.eq.s32.totalorder %v3836_v31, %v2354_v23  ;;  %v2828_v31 = vld [vmem:[%s4321_s4 + $0x10] sm:$0xff] }
 0x8c1   : > { %v2874_v24 = vsel %vm2355_vm7, 1.0, %v3602_v32 }
 0x8c2   : > { %v2358_v25 = vmul.f32 %v3571_v12, %v2874_v24 }
 0x8c4   : > { %v2432_v28 = vsel %vm626_vm6, %v2358_v25, 0.0 }
 0x8c5   : > { %2433 = vadd.xlane.f32.xlu0 %v2432_v28 }
 0x8d5   : > { %v1884_v6 = vpop.trf.xlu1 }
 0x8d6   : > { %3305 = vmatmul.mubr.msk.f32.vlgmr.msra.gmra.mxu0 %vm761_vm13, %v1884_v6 }
 0x8d7   : > { %3307 = vmatprep.mubr.msk.f32.mxu0 %vm3603_vm1, %v3602_v32 }
 0x8d9   : > { %v1885_v54 = vpop.trf.xlu1 }
 0x8da   : > { %3308 = vmatmul.mubr.msk.f32.gmra.mxu0 %vm761_vm13, %v1885_v54  ;;  %v2863_v54 = vld [vmem:[%s4321_s4 + $0x18] sm:$0xff] }
 0x8db   : > { %3310 = vmatprep.mubr.msk.f32.mxu0 %vm3603_vm1, %v3602_v32 }
 0x8dd   : > { %v1886_v10 = vpop.trf.xlu1 }
 0x8de   : > { %3311 = vmatmul.mubr.msk.f32.gmra.mxu0 %vm761_vm13, %v1886_v10 }
 0x8df   : > { %3319 = vmatprep.mubr.msk.f32.mxu0 %vm3603_vm1, %v3602_v32 }
 0x8ff   : > { %v2637_v12 = vpop.permute.xlu1 %2636 }
 0x94e   : > { %v2434_v53 = vpop.xlane.xlu0 %2433 }
 0x94f   : > { %v2435_v56 = vadd.f32 1.0, %v2434_v53 }
 0x951   : > { %3572 = vrcp.f32 %v2435_v56 }
 0x95e   : > { %v3573_v5 = vpop.eup %3572 }
 0x996   : > { %v1975_v29 = vpop.f32.mrf.mxu0 }
 0x998   : > { %v3306_v1 = vpop.f32.mrf.mxu0 }
 0x99a   : > { %v1980_v30 = vpop.f32.mrf.mxu0 }
 0x99c   : > { %v3309_v33 = vpop.f32.mrf.mxu0 }
 0x99e   : > { %v1985_v34 = vpop.f32.mrf.mxu0 }
 0x99f   : > { %3314 = vmatpush3.msra.mxu0 %v1985_v34 }
 0x9a0   : > { %v3312_v37 = vpop.f32.mrf.mxu0  ;;  %3315 = vmatprep.subr.mxu0 %v3602_v32 }
 0x9a1   : > { %3316 = vmatpush3.msra.mxu0 %v1980_v30 }
 0x9a2   : > { %3317 = vmatprep.subr.mxu0 %v3602_v32 }
 0x9a3   : > { %3318 = vmatpush3.msra.mxu0 %v1975_v29 }
 0x9a4   : > { %3320 = vmatmul.mubr.msk.f32.vlgmr.msra.gmra.mxu0 %vm391_vm0, %v2828_v31  ;;  %3341 = vmatprep.subr.mxu0 %v3602_v32 }
 0x9a5   : > { %3342 = vmatpush3.msra.mxu0 %v3013_v38  ;;  %3357 = vmatprep.mubr.msk.f32.mxu0 %vm3603_vm1, %v3602_v32 }
 0x9a6   : > { %3343 = vmatprep.subr.mxu0 %v3602_v32 }
 0x9a7   : > { %3344 = vmatpush3.msra.mxu0 %v3012_v36 }
 0x9a8   : > { %3345 = vmatprep.subr.mxu0 %v3602_v32 }
 0x9a9   : > { %3346 = vmatpush3.msra.mxu0 %v3009_v63 }
 0x9aa   : > { %3347 = vmatprep.subr.mxu0 %v3602_v32 }
 0x9ab   : > { %3348 = vmatpush3.msra.mxu0 %v3008_v39 }
 0x9ac   : > { %3349 = vmatprep.subr.mxu0 %v3602_v32 }
 0x9ad   : > { %3350 = vmatpush3.msra.mxu0 %v3005_v44 }
 0x9ae   : > { %3351 = vmatprep.subr.mxu0 %v3602_v32 }
 0x9af   : > { %3352 = vmatpush3.msra.mxu0 %v3004_v41 }
 0x9b0   : > { %3353 = vmatprep.subr.mxu0 %v3602_v32 }
 0x9b1   : > { %3354 = vmatpush3.msra.mxu0 %v3001_v43 }
 0x9b2   : > { %3355 = vmatprep.subr.mxu0 %v3602_v32 }
 0x9b3   : > { %3356 = vmatpush3.msra.mxu0 %v3000_v46 }
 0x9b4   : > { %3358 = vmatmul.mubr.msk.f32.vlgmr.msra.gmra.mxu0 %vm626_vm6, %v2358_v25  ;;  %3360 = vmatprep.subr.mxu0 %v3602_v32 }
 0x9b5   : > { %3361 = vmatpush3.msra.mxu0 %v2358_v25  ;;  %3362 = vmatprep.mubr.msk.f32.mxu0 %vm3603_vm1, %v3602_v32 }
 0x9b6   : > { %3371 = vmatprep.subr.mxu0 %v3602_v32 }
 0xa64   : > { %v2058_v16 = vpop.f32.mrf.mxu0 }
 0xa65   : > { %v2062_v26 = vadd.f32 %v2058_v16, %v1490_v48 }
 0xa66   : > { %v3321_v9 = vpop.f32.mrf.mxu0 }
 0xa74   : > { %v2428_v49 = vpop.f32.mrf.mxu0 }
 0xa75   : > { %v2429_v47 = vadd.f32 %v2428_v49, %v2085_v0 }
 0xa76   : > { %v3359_v8 = vpop.f32.mrf.mxu0 }
 0xa77   : > { %v2437_v17 = vmul.f32 %v3573_v5, %v2429_v47 }
 0xa79   : > { %2438 = vxpose.xlu0.b32.start.end [1/1] (short) (narrow) %v2437_v17, 24 }
 0xaa2   : > { %3405 = vset.pattern.permute.xlu0 %v3604_v51 }
 0xaf5   : > { %v2454_v50 = vpop.trf.xlu0 }
 0xaf6   : > { %3363 = vmatmul.mubr.msk.f32.vlgmr.msra.gmra.mxu0 %vm761_vm13, %v2454_v50 }
 0xaf7   : > { %3365 = vmatprep.mubr.msk.f32.mxu0 %vm3603_vm1, %v3602_v32 }
 0xaf9   : > { %v2455_v2 = vpop.trf.xlu0 }
 0xafa   : > { %3366 = vmatmul.mubr.msk.f32.gmra.mxu0 %vm761_vm13, %v2455_v2 }
 0xafb   : > { %3368 = vmatprep.mubr.msk.f32.mxu0 %vm3603_vm1, %v3602_v32 }
 0xafd   : > { %v2456_v45 = vpop.trf.xlu0 }
 0xafe   : > { %3369 = vmatmul.mubr.msk.f32.gmra.mxu0 %vm761_vm13, %v2456_v45 }
 0xaff   : > { %3377 = vmatprep.mubr.msk.f32.mxu0 %vm3603_vm1, %v3602_v32 }
 0xbb6   : > { %v2545_v61 = vpop.f32.mrf.mxu0 }
 0xbb8   : > { %v3364_v42 = vpop.f32.mrf.mxu0 }
 0xbba   : > { %v2550_v52 = vpop.f32.mrf.mxu0 }
 0xbbc   : > { %v3367_v4 = vpop.f32.mrf.mxu0 }
 0xbbe   : > { %v2555_v7 = vpop.f32.mrf.mxu0 }
 0xbbf   : > { %3372 = vmatpush3.msra.mxu0 %v2555_v7 }
 0xbc0   : > { %v3370_v6 = vpop.f32.mrf.mxu0  ;;  %3373 = vmatprep.subr.mxu0 %v3602_v32 }
 0xbc1   : > { %3374 = vmatpush3.msra.mxu0 %v2550_v52 }
 0xbc2   : > { %3375 = vmatprep.subr.mxu0 %v3602_v32 }
 0xbc3   : > { %3376 = vmatpush3.msra.mxu0 %v2545_v61 }
 0xbc4   : > { %3378 = vmatmul.mubr.msk.f32.vlgmr.msra.gmra.mxu0 %vm391_vm0, %v2863_v54 }
 0xc84   : > { %v2628_v10 = vpop.f32.mrf.mxu0 }
 0xc85   : > { %v2632_v55 = vadd.f32 %v2628_v10, %v2062_v26 }
 0xc86   : > { %v3379_v58 = vpop.f32.mrf.mxu0 }
 0xc87   : > { %v2639_v27 = vadd.f32 %v2637_v12, %v2632_v55 }
 0xc89   : > { %2640 = vst.msk [vmem:[%s350_s17] sm:$0xff] %vm626_vm6, %v2639_v27 }
 0xc8a PF: > { %s18_s24 = sadd.s32 1, %s3599_s24  }
 0xc8b   : > { %p15_p1 = scmp.ge.s32.totalorder %s18_s24, 4  }
 0xc8d   :  { %17 = sbr.rel (!%p15_p1) target bundleno = 1 (0x1), region = 107 }
 0xc92   :  { %2660 = vsyncpa [#allocation3], 1 }
 0xc93   :  { %2662 = vsyncpa [#allocation3 + $0x1], 1 }

</bundles_post_ra>
